<compile_context>
chip_gen: v7x
topology: tpu7x:2x2x1
jax: 0.10.0
libtpu: 0.0.40
codegen_flags: <defaults>
</compile_context>

<pallas_src>
import functools

import jax
import jax.numpy as jnp
from jax.experimental import pallas as pl
from jax.experimental.pallas import tpu as pltpu


def _round_up(x, m):
    return -(-x // m) * m


def _vmem_capacity_bytes():
    """Physical VMEM per TensorCore, with a conservative fallback."""
    try:
        cap = int(getattr(pltpu.get_tpu_info(), "vmem_capacity_bytes", 0))
        if cap > 0:
            return cap
    except Exception:
        pass
    return 128 * 1024 * 1024


def _estimate_vmem(ti, tj, dim, Le, Mp, io_bytes=4):
    """Rough per-step VMEM footprint: double-buffered IO blocks plus the live
    in-kernel temporaries (w, w_hat/w2d, edge/res/product), with (sublane,
    lane) padding of every tile accounted for."""
    q_blk = Le * _round_up(ti, 16) * 128 * 2                     # bf16, Mp lane-padded
    k_blk = Le * _round_up(Mp, 16) * _round_up(tj, 128) * 2      # bf16, node lane-dense
    io_blk = ti * _round_up(tj, 8) * _round_up(dim, 128) * io_bytes
    w_blk = Le * _round_up(ti, 8) * _round_up(tj, 128) * 4       # f32 inner products
    tjd_f32 = ti * _round_up(tj, 8) * _round_up(dim, 128) * 4    # edge / res / gate*res
    return (2 * (q_blk + k_blk + 2 * io_blk)     # double-buffered pipeline blocks
            + 2 * w_blk                          # w (f32) + w_hat/w2d (bf16) copies
            + 4 * tjd_f32)                       # projection-sized temporaries


def _choose_tiles(n, dim, Le, Mp, budget_bytes, io_bytes=4):
    """Prefer a large i-tile (multiples of 16) and a lane-dense j-tile
    (multiples of 128); fall back to full-n tiles for awkward n."""
    def cands(step, cap):
        c = {n}
        t = step
        while t <= min(n, cap):
            if n % t == 0:
                c.add(t)
            t += step
        return sorted(c, reverse=True)

    ti_cands = cands(16, 512)
    tj_cands = cands(128, 1024)
    for ti in ti_cands:                 # large ti first: amortizes MXU weight pushes,
        for tj in tj_cands:             # cuts k re-fetch and per-step overhead
            if _estimate_vmem(ti, tj, dim, Le, Mp, io_bytes) <= budget_bytes:
                return ti, tj
    return ti_cands[-1], tj_cands[-1]


def _htr_kernel(q_ref, k_ref, t_ref, we_ref, wr_ref, o_ref, *, eps):
    # q_ref : (1, Le, ti, Mp)  bf16 queries for this i-block (degrees stacked on Le)
    # k_ref : (1, Le, Mp, tj)  bf16 keys for this j-block, node axis lane-dense
    # t_ref : (1, ti, tj, dim) edge features t_ij
    # we_ref: (Le, dim) bf16   edge_proj weight^T with LayerNorm gamma folded in
    # wr_ref: (dim, dim) bf16  residue_update weight^T
    # o_ref : (1, ti, tj, dim)
    q = q_ref[0]                               # [Le, ti, Mp]
    k = k_ref[0]                               # [Le, Mp, tj]
    Le, ti, _ = q.shape
    tj = k.shape[2]
    dim = t_ref.shape[3]

    # 1) pairwise per-channel inner products, batched over Le on the MXU
    #    (bf16 operands, f32 accumulation):
    #    w[l, i, j] = sum_m q[l, i, m] * k[l, m, j]   (m is zero-padded)
    w = jax.lax.dot_general(
        q, k, dimension_numbers=(((2,), (1,)), ((0,), (0,))),
        preferred_element_type=jnp.float32)                    # [Le, ti, tj] f32

    # 2) LayerNorm over the channel axis (leading axis -> plain VPU adds over
    #    lane-dense [ti, tj] planes).  Biased variance, eps inside the sqrt,
    #    gamma folded into we_ref, no bias (matches torch LayerNorm(bias=False)).
    mean = jnp.mean(w, axis=0, keepdims=True)
    cen = w - mean
    var = jnp.mean(cen * cen, axis=0, keepdims=True)
    w_hat = (cen * jax.lax.rsqrt(var + eps)).astype(jnp.bfloat16)

    # 3) edge projection: contract the Le axis with an LHS-transposed (TN)
    #    matmul — no explicit transpose of the large intermediate; the bf16
    #    cast above halves the bytes moved by the lane-merging reshape.
    w2d = w_hat.reshape(Le, ti * tj)                           # [Le, ti*tj] bf16
    edge = jax.lax.dot_general(
        w2d, we_ref[...], dimension_numbers=(((0,), (0,)), ((), ())),
        preferred_element_type=jnp.float32)                    # [ti*tj, dim] f32
    gate = jax.nn.sigmoid(edge)

    # 4) residue update: bias-free linear on t_ij (leading-dim reshape keeps
    #    dim minor, so it is layout-preserving; cast after the reshape).
    t2d = t_ref[0].reshape(ti * tj, dim).astype(jnp.bfloat16)
    res = jnp.dot(t2d, wr_ref[...], preferred_element_type=jnp.float32)

    o_ref[0] = (gate * res).reshape(ti, tj, dim).astype(o_ref.dtype)


def hierarchical_tensor_refinement(t_ij, x_list, params, *, tile_i=None,
                                   tile_j=None, eps=1e-5):
    """params = dict(to_queries[d,e], to_keys[L,d,e], ln_w[Le],
                     edge_proj_w[dim, Le], residue_w[dim, dim])"""
    b, n, _, dim = t_ij.shape
    Wq = params["to_queries"]
    Wk = params["to_keys"]                          # [L, d, e]
    L, d, e = Wk.shape
    Le = L * e
    m_dims = [xl.shape[-1] for xl in x_list]
    Mp = int(_round_up(max(m_dims), 16))            # bf16 sublane tile for k blocks

    # --- glue (plain JAX): per-node projections, pad m, stack degrees, bf16 ---
    q_parts, k_parts = [], []
    for l, xl in enumerate(x_list):
        m_l = xl.shape[-1]
        ql = jnp.einsum('bndm,de->benm', xl, Wq)        # [b, e, n, m_l]
        kl = jnp.einsum('bndm,de->bemn', xl, Wk[l])     # [b, e, m_l, n]
        q_parts.append(jnp.pad(ql, ((0, 0), (0, 0), (0, 0), (0, Mp - m_l))))
        k_parts.append(jnp.pad(kl, ((0, 0), (0, 0), (0, Mp - m_l), (0, 0))))
    q_cat = jnp.concatenate(q_parts, axis=1).astype(jnp.bfloat16)   # [b, Le, n, Mp]
    k_cat = jnp.concatenate(k_parts, axis=1).astype(jnp.bfloat16)   # [b, Le, Mp, n]

    # fold LayerNorm gamma into the (pre-transposed) edge_proj weight; bf16 MXU inputs
    we_s = (params["ln_w"][:, None] * params["edge_proj_w"].T).astype(jnp.bfloat16)
    wr_t = params["residue_w"].T.astype(jnp.bfloat16)               # [dim, dim]

    io_bytes = t_ij.dtype.itemsize
    vmem_cap = _vmem_capacity_bytes()
    vmem_limit = min(int(0.75 * vmem_cap), 100 * 1024 * 1024)  # ~96 MiB v5e/v6e, ~48 MiB v7x
    budget = vmem_limit - 4 * 1024 * 1024                      # headroom for Mosaic scratch

    ti0, tj0 = _choose_tiles(n, dim, Le, Mp, budget, io_bytes)
    ti = tile_i if tile_i is not None else ti0
    tj = tile_j if tile_j is not None else tj0
    assert n % ti == 0 and n % tj == 0
    assert ti == n or ti % 16 == 0, "tile_i must be a multiple of 16 (or == n)"
    assert tj == n or tj % 128 == 0, "tile_j must be a multiple of 128 (or == n)"
    est = _estimate_vmem(ti, tj, dim, Le, Mp, io_bytes)
    assert est <= vmem_limit, (
        f"tiles ({ti},{tj}) need ~{est >> 20} MiB VMEM > limit {vmem_limit >> 20} MiB")

    grid = (b, n // ti, n // tj)                # j fastest: q block stays resident

    kernel = functools.partial(_htr_kernel, eps=eps)
    return pl.pallas_call(
        kernel,
        out_shape=jax.ShapeDtypeStruct((b, n, n, dim), t_ij.dtype),
        grid_spec=pltpu.PrefetchScalarGridSpec(
            num_scalar_prefetch=0,
            grid=grid,
            in_specs=[
                pl.BlockSpec((1, Le, ti, Mp), lambda bi, ii, jj: (bi, 0, ii, 0)),
                pl.BlockSpec((1, Le, Mp, tj), lambda bi, ii, jj: (bi, 0, 0, jj)),
                pl.BlockSpec((1, ti, tj, dim), lambda bi, ii, jj: (bi, ii, jj, 0)),
                pl.BlockSpec((Le, dim), lambda bi, ii, jj: (0, 0)),
                pl.BlockSpec((dim, dim), lambda bi, ii, jj: (0, 0)),
            ],
            out_specs=pl.BlockSpec((1, ti, tj, dim),
                                   lambda bi, ii, jj: (bi, ii, jj, 0)),
        ),
        compiler_params=pltpu.CompilerParams(
            dimension_semantics=("parallel", "parallel", "parallel"),
            vmem_limit_bytes=int(vmem_limit)),
    )(q_cat, k_cat, t_ij, we_s, wr_t)


def reference(t_ij, x_list, params, eps=1e-5):
    Wq, Wk = params["to_queries"], params["to_keys"]
    queries = [jnp.einsum('bndm,de->bnem', xl, Wq) for xl in x_list]
    keys = [jnp.einsum('bndm,de->bnem', xl, Wk[l]) for l, xl in enumerate(x_list)]
    inner = [jnp.einsum('biem,bjem->bije', q, k) for q, k in zip(queries, keys)]
    w = jnp.concatenate(inner, axis=-1)
    mean = w.mean(-1, keepdims=True)
    var = ((w - mean) ** 2).mean(-1, keepdims=True)
    w = (w - mean) / jnp.sqrt(var + eps) * params["ln_w"]
    gate = jax.nn.sigmoid(w @ params["edge_proj_w"].T)
    res = t_ij @ params["residue_w"].T
    return gate * res


if __name__ == "__main__":
    # small shapes consistent with the module
    b, n, dim = 2, 8, 32
    dim_edge_refinement = 16
    max_degree = 2
    m_dims = [2 * (l + 1) + 1 for l in range(max_degree)]   # 3, 5
    Le = dim_edge_refinement * max_degree

    key = jax.random.PRNGKey(0)
    ks = jax.random.split(key, 8)

    params = {
        "to_queries": jax.random.normal(ks[0], (dim, dim_edge_refinement), jnp.float32),
        "to_keys": jax.random.normal(ks[1], (max_degree, dim, dim_edge_refinement), jnp.float32),
        "ln_w": jnp.ones((Le,), jnp.float32),                       # PyTorch LayerNorm init
        "edge_proj_w": 0.1 * jax.random.normal(ks[2], (dim, Le), jnp.float32),
        "residue_w": 0.1 * jax.random.normal(ks[3], (dim, dim), jnp.float32),
    }

    t_ij = jax.random.normal(ks[4], (b, n, n, dim), jnp.float32)
    x_list = [jax.random.normal(ks[5 + l], (b, n, dim, m_dims[l]), jnp.float32)
              for l in range(max_degree)]

    out = hierarchical_tensor_refinement(t_ij, x_list, params)
    out = jax.block_until_ready(out)

    ref = reference(t_ij, x_list, params)
    assert out.shape == (b, n, n, dim)
    # bf16 MXU operands -> compare against the f32 reference at bf16 tolerance
    assert jnp.allclose(out, ref, rtol=2e-2, atol=2e-2), "mismatch vs reference"

    print("KERNEL_OK")
</pallas_src>

<mosaic_0001>
module attributes {stable_mosaic.version = 11 : i64} {
  func.func @_htr_kernel(%arg0: i32, %arg1: i32, %arg2: i32, %arg3: memref<1x32x8x16xbf16, #tpu.memory_space<vmem>>, %arg4: memref<1x32x16x8xbf16, #tpu.memory_space<vmem>>, %arg5: memref<1x8x8x32xf32, #tpu.memory_space<vmem>>, %arg6: memref<32x32xbf16, #tpu.memory_space<vmem>>, %arg7: memref<32x32xbf16, #tpu.memory_space<vmem>>, %arg8: memref<1x8x8x32xf32, #tpu.memory_space<vmem>>) attributes {dimension_semantics = [#tpu.dimension_semantics<parallel>, #tpu.dimension_semantics<parallel>, #tpu.dimension_semantics<parallel>], iteration_bounds = array<i64: 2, 1, 1>, scalar_prefetch = 0 : i64, scratch_operands = 0 : i64, tpu.core_type = #tpu.core_type<tc>, window_params = [{transform_indices = @transform_0, window_bounds = array<i64: 1, 32, 8, 16>}, {transform_indices = @transform_1, window_bounds = array<i64: 1, 32, 16, 8>}, {transform_indices = @transform_2, window_bounds = array<i64: 1, 8, 8, 32>}, {pipeline_mode = #tpu.pipeline_mode<synchronous>, transform_indices = @transform_3, window_bounds = array<i64: 32, 32>}, {pipeline_mode = #tpu.pipeline_mode<synchronous>, transform_indices = @transform_4, window_bounds = array<i64: 32, 32>}, {transform_indices = @transform_5, window_bounds = array<i64: 1, 8, 8, 32>}]} {
    %c0 = arith.constant 0 : index
    %c0_0 = arith.constant 0 : index
    %c0_1 = arith.constant 0 : index
    %c0_2 = arith.constant 0 : index
    %0 = vector.load %arg3[%c0, %c0_0, %c0_1, %c0_2] : memref<1x32x8x16xbf16, #tpu.memory_space<vmem>>, vector<1x32x8x16xbf16>
    %1 = vector.shape_cast %0 : vector<1x32x8x16xbf16> to vector<32x8x16xbf16>
    %c0_3 = arith.constant 0 : index
    %c0_4 = arith.constant 0 : index
    %c0_5 = arith.constant 0 : index
    %c0_6 = arith.constant 0 : index
    %2 = vector.load %arg4[%c0_3, %c0_4, %c0_5, %c0_6] : memref<1x32x16x8xbf16, #tpu.memory_space<vmem>>, vector<1x32x16x8xbf16>
    %3 = vector.shape_cast %2 : vector<1x32x16x8xbf16> to vector<32x16x8xbf16>
    %cst = arith.constant dense<0.000000e+00> : vector<32x8x8xf32>
    %4 = tpu.matmul %1, %3, %cst {dimension_numbers = #tpu.dot_dimension_numbers<[2], [1], [1], [2], [0, 0, 0, 1, 1, 2], [0], [0]>} : vector<32x8x16xbf16>, vector<32x16x8xbf16>, vector<32x8x8xf32> -> vector<32x8x8xf32>
    %cst_7 = arith.constant dense<0.000000e+00> : vector<8x8xf32>
    %5 = vector.multi_reduction <add>, %4, %cst_7 [0] : vector<32x8x8xf32> to vector<8x8xf32>
    %6 = vector.shape_cast %5 : vector<8x8xf32> to vector<1x8x8xf32>
    %cst_8 = arith.constant 3.200000e+01 : f32
    %7 = vector.broadcast %cst_8 : f32 to vector<1x8x8xf32>
    %8 = arith.divf %6, %7 : vector<1x8x8xf32>
    %9 = vector.broadcast %8 : vector<1x8x8xf32> to vector<32x8x8xf32>
    %10 = arith.subf %4, %9 : vector<32x8x8xf32>
    %11 = arith.mulf %10, %10 : vector<32x8x8xf32>
    %cst_9 = arith.constant dense<0.000000e+00> : vector<8x8xf32>
    %12 = vector.multi_reduction <add>, %11, %cst_9 [0] : vector<32x8x8xf32> to vector<8x8xf32>
    %13 = vector.shape_cast %12 : vector<8x8xf32> to vector<1x8x8xf32>
    %cst_10 = arith.constant 3.200000e+01 : f32
    %14 = vector.broadcast %cst_10 : f32 to vector<1x8x8xf32>
    %15 = arith.divf %13, %14 : vector<1x8x8xf32>
    %cst_11 = arith.constant 9.99999974E-6 : f32
    %16 = vector.broadcast %cst_11 : f32 to vector<1x8x8xf32>
    %17 = arith.addf %15, %16 : vector<1x8x8xf32>
    %18 = math.rsqrt %17 : vector<1x8x8xf32>
    %19 = vector.broadcast %18 : vector<1x8x8xf32> to vector<32x8x8xf32>
    %20 = arith.mulf %10, %19 : vector<32x8x8xf32>
    %21 = arith.truncf %20 : vector<32x8x8xf32> to vector<32x8x8xbf16>
    %22 = vector.shape_cast %21 : vector<32x8x8xbf16> to vector<32x64xbf16>
    %c0_12 = arith.constant 0 : index
    %c0_13 = arith.constant 0 : index
    %23 = vector.load %arg6[%c0_12, %c0_13] : memref<32x32xbf16, #tpu.memory_space<vmem>>, vector<32x32xbf16>
    %cst_14 = arith.constant dense<0.000000e+00> : vector<64x32xf32>
    %24 = tpu.matmul %22, %23, %cst_14 {dimension_numbers = #tpu.dot_dimension_numbers<[0], [0], [1], [1], [0, 1, 1, 1], [], []>} : vector<32x64xbf16>, vector<32x32xbf16>, vector<64x32xf32> -> vector<64x32xf32>
    %25 = arith.negf %24 : vector<64x32xf32>
    %26 = math.exp %25 : vector<64x32xf32>
    %cst_15 = arith.constant 1.000000e+00 : f32
    %27 = vector.broadcast %cst_15 : f32 to vector<64x32xf32>
    %28 = arith.addf %27, %26 : vector<64x32xf32>
    %29 = arith.divf %27, %28 : vector<64x32xf32>
    %c0_16 = arith.constant 0 : index
    %c0_17 = arith.constant 0 : index
    %c0_18 = arith.constant 0 : index
    %c0_19 = arith.constant 0 : index
    %30 = vector.load %arg5[%c0_16, %c0_17, %c0_18, %c0_19] : memref<1x8x8x32xf32, #tpu.memory_space<vmem>>, vector<1x8x8x32xf32>
    %31 = vector.shape_cast %30 : vector<1x8x8x32xf32> to vector<8x8x32xf32>
    %32 = vector.shape_cast %31 : vector<8x8x32xf32> to vector<64x32xf32>
    %33 = arith.truncf %32 : vector<64x32xf32> to vector<64x32xbf16>
    %c0_20 = arith.constant 0 : index
    %c0_21 = arith.constant 0 : index
    %34 = vector.load %arg7[%c0_20, %c0_21] : memref<32x32xbf16, #tpu.memory_space<vmem>>, vector<32x32xbf16>
    %cst_22 = arith.constant dense<0.000000e+00> : vector<64x32xf32>
    %35 = tpu.matmul %33, %34, %cst_22 {dimension_numbers = #tpu.dot_dimension_numbers<[1], [0], [0], [1], [0, 0, 1, 1], [], []>} : vector<64x32xbf16>, vector<32x32xbf16>, vector<64x32xf32> -> vector<64x32xf32>
    %36 = arith.mulf %29, %35 : vector<64x32xf32>
    %37 = vector.shape_cast %36 : vector<64x32xf32> to vector<8x8x32xf32>
    %c0_23 = arith.constant 0 : index
    %c0_24 = arith.constant 0 : index
    %c0_25 = arith.constant 0 : index
    %c0_26 = arith.constant 0 : index
    %38 = vector.load %arg8[%c0_23, %c0_24, %c0_25, %c0_26] : memref<1x8x8x32xf32, #tpu.memory_space<vmem>>, vector<1x8x8x32xf32>
    %39 = vector.shape_cast %38 : vector<1x8x8x32xf32> to vector<8x8x32xf32>
    %40 = vector.shape_cast %37 : vector<8x8x32xf32> to vector<1x8x8x32xf32>
    tpu.vector_store %arg8[%c0_23, %c0_24, %c0_25, %c0_26], %40 {strides = array<i32>} : memref<1x8x8x32xf32, #tpu.memory_space<vmem>>, vector<1x8x8x32xf32>,
    return
  }
  func.func @transform_0(%arg0: i32, %arg1: i32, %arg2: i32) -> (i32, i32, i32, i32) {
    %c0_i32 = arith.constant 0 : i32
    %c0_i32_0 = arith.constant 0 : i32
    %c0_i32_1 = arith.constant 0 : i32
    return %arg0, %c0_i32, %arg1, %c0_i32_0 : i32, i32, i32, i32
  }
  func.func @transform_1(%arg0: i32, %arg1: i32, %arg2: i32) -> (i32, i32, i32, i32) {
    %c0_i32 = arith.constant 0 : i32
    %c0_i32_0 = arith.constant 0 : i32
    %c0_i32_1 = arith.constant 0 : i32
    return %arg0, %c0_i32, %c0_i32_0, %arg2 : i32, i32, i32, i32
  }
  func.func @transform_2(%arg0: i32, %arg1: i32, %arg2: i32) -> (i32, i32, i32, i32) {
    %c0_i32 = arith.constant 0 : i32
    %c0_i32_0 = arith.constant 0 : i32
    return %arg0, %arg1, %arg2, %c0_i32 : i32, i32, i32, i32
  }
  func.func @transform_3(%arg0: i32, %arg1: i32, %arg2: i32) -> (i32, i32) {
    %c0_i32 = arith.constant 0 : i32
    %c0_i32_0 = arith.constant 0 : i32
    %c0_i32_1 = arith.constant 0 : i32
    return %c0_i32, %c0_i32_0 : i32, i32
  }
  func.func @transform_4(%arg0: i32, %arg1: i32, %arg2: i32) -> (i32, i32) {
    %c0_i32 = arith.constant 0 : i32
    %c0_i32_0 = arith.constant 0 : i32
    %c0_i32_1 = arith.constant 0 : i32
    return %c0_i32, %c0_i32_0 : i32, i32
  }
  func.func @transform_5(%arg0: i32, %arg1: i32, %arg2: i32) -> (i32, i32, i32, i32) {
    %c0_i32 = arith.constant 0 : i32
    %c0_i32_0 = arith.constant 0 : i32
    return %arg0, %arg1, %arg2, %c0_i32 : i32, i32, i32, i32
  }
}

</mosaic_0001>

<bundles_post_ra>
// kernel: tpu_custom_call.1
= control target key start
LH: loop header
LB: loop body
LE: loop exit
PB: predicated region body
PF: predicated region fallthrough
CT: control target
= control target key end

     0   :  { %s5054_s0 = inlined_call_operand.hbm [shape: bf16[2,32,8,16], index: 0, kind: input, shape index: {}]   ;;  %s5055_s1 = inlined_call_operand.hbm [shape: bf16[2,32,16,8], index: 1, kind: input, shape index: {}]   ;;  %s5056_s2 = inlined_call_operand.hbm [shape: f32[2,8,8,32], index: 2, kind: input, shape index: {}]   ;;  %s5057_s3 = inlined_call_operand.hbm [shape: bf16[32,32], index: 3, kind: input, shape index: {}]   ;;  %s5058_s4 = inlined_call_operand.hbm [shape: bf16[32,32], index: 4, kind: input, shape index: {}]   ;;  %s5059_s5 = inlined_call_operand.hbm [shape: f32[2,8,8,32], index: 5, kind: output, shape index: {}]  }
   0x1   :  { %5078 = sst [smem:[#allocation18_spill]] %s5055_s1 }
   0x2   :  { %5079 = sst [smem:[#allocation19_spill]] %s5057_s3 }
   0x3   :  { %5080 = sst [smem:[#allocation20_spill]] %s5058_s4 }
   0x4   :  { %5081 = sst [smem:[#allocation21_spill]] %s5059_s5 }
   0x5   :  { %10 = vsyncpa [#allocation3], 0 }
   0x6   :  { %12 = vsyncpa [#allocation3 + $0x1], 0 }
   0x7   :  { %13 = vsyncpa [#allocation6], 0 }
   0x8   :  { %15 = vsyncpa [#allocation6 + $0x1], 0 }
   0x9   :  { %16 = vsyncpa [#allocation9], 0 }
   0xa   :  { %17 = vsyncpa [#allocation4], 0 }
   0xb   :  { %19 = vsyncpa [#allocation4 + $0x1], 0  ;;  %s4044_s18 = smov 0   ;;  %s4046_s19 = smov 0  }
   0xc   :  { %s4048_s20 = smov 0   ;;  %s4050_s21 = smov 0  }
   0xd   :  { %s4052_s22 = smov 0   ;;  %s4054_s23 = smov 0  }
   0xe LB: > { %5082 = sst [smem:[#allocation16_spill]] %s3970_s18  ;;  %s4075_s24 = sadd.s32 4294967295, %s3990_s23   ;;  %s3990_s23 = sphi %s4054_s23, %s25_s23   ;;  %s3986_s22 = sphi %s4052_s22, %s5119_s22   ;;  %s3982_s21 = sphi %s4050_s21, %s5118_s21   ;;  %s3978_s20 = sphi %s4048_s20, %s5117_s20   ;;  %s3974_s19 = sphi %s4046_s19, %s5116_s19   ;;  %s3970_s18 = sphi %s4044_s18, %s5115_s18  }
   0xf   : > { %s3152_s25 = sadd.s32 4294967294, %s3990_s23   ;;  %p60_p0 = scmp.ne.s32.totalorder %s3978_s20, %s3974_s19 }
  0x10   : > { %p61_p1 = scmp.eq.s32.totalorder %s3990_s23, 0  ;;  %p66_p2 = scmp.ne.s32.totalorder %s3974_s19, %s3970_s18 }
  0x11   : > { %p5060_p3 = scmp.eq.s32.totalorder %s4075_s24, 0  ;;  %p194_p4 = scmp.eq.s32.totalorder %s4075_s24, 1 }
  0x12   : > { %p4086_p5 = por %p61_p1, %p60_p0  ;;  %p200_p6 = scmp.eq.s32.totalorder %s3152_s25, 1 }
  0x13   : > { %p4092_p7 = por %p5060_p3, %p66_p2  ;;  %p4096_p8 = por %p194_p4, %p60_p0 }
  0x14   : > { %p4100_p9 = por %p200_p6, %p66_p2  ;;  %p3153_p10 = scmp.ge.s32.totalorder %s3990_s23, 1 }
  0x15   : > { %s5084_s28 = scalar_select %p4092_p7, 1, 0 }
  0x16   : > { %s5085_s29 = scalar_select %p4096_p8, 1, 0 }
  0x17   : > { %s5086_s30 = scalar_select %p4100_p9, 1, 0 }
  0x18   : > { %p207_p11 = scmp.lt.s32.totalorder %s3990_s23, 3  ;;  %s3992_s7 = smov [#allocation8]  }
  0x19   : > { %5087 = sst [smem:[#allocation17_spill]] %s5086_s30  ;;  %s219_s8 = sshll.u32 %s3992_s7, 4  ;;  %s4110_s8 = int_to_ptr.vmem [resolvable:$true] %s219_s8 }
  0x1a   : > { %p4106_p12 = pnand %p3153_p10, %p207_p11  ;;  %s44_s10 = sadd.s32 1, %s3986_s22 }
  0x1b   : > { %s4124_s11 = sand.u32 1, %s3978_s20   ;;  %p4126_p4 = scmp.ge.s32.totalorder %s44_s10, 2 }
  0x1c   : > { %s5088_s6 = scalar_select %p4106_p12, 1, 0 }
  0x1d   : > { %p3590_p13 = pneg %p4106_p12  ;;  %s5091_s3 = sld [smem:[#allocation19_spill]] }
  0x1f   : > { %p4118_p2 = pnand %p3590_p13, %p5060_p3 }
  0x21   : > { %s5089_s9 = scalar_select %p4118_p2, 1, 0 }
  0x22   : > { %p5071_p10 = pneg %p4118_p2 }
  0x23   : > { %s3754_s15 = scalar_lea.hbm %s5091_s3, 256 }
  0x24   : > { %p3755_p6 = scmp.ne.s32.totalorder %s5091_s3, %s3754_s15  ;;  %p3761_p0 = scmp.lt.u32.totalorder %s3754_s15, %s5091_s3 }
  0x26   : > { %p3757_p11 = pnand %p5071_p10, %p3755_p6 }
  0x28   : > { %p3758_p13 = pneg %p3757_p11 }
  0x2a   : > { %p3763_p3 = pnand %p3761_p0, %p3758_p13 }
  0x2c   : > { %3766 = shalt.err (!%p3763_p3)
}
  0x2d   : > { %s3767_s13 = scalar_lea.vmem %s4110_s8, 256  ;;  %p3775_p7 = scmp.lt.s32.totalorder %s4110_s8, %s4110_s8 }
  0x2e   : > { %p3768_p1 = scmp.ne.s32.totalorder %s4110_s8, %s3767_s13  ;;  %p3776_p6 = scmp.lt.s32.totalorder %s3767_s13, %s3767_s13 }
  0x30   : > { %p3770_p9 = pnand %p3768_p1, %p5071_p10  ;;  %p3777_p11 = por %p3776_p6, %p3775_p7 }
  0x32   : > { %p3771_p8 = pneg %p3770_p9 }
  0x34   : > { %p3778_p12 = pnand %p3777_p11, %p3771_p8 }
  0x36   : > { %3781 = shalt.err (!%p3778_p12)
}
  0x37   : > { %s5067_s14 = smov 64   ;;  %s5069_s15 = smov 4  }
  0x38   : > { %3593 = dma.hbm_to_vmem [thread:$0]  (!%p4118_p2), %s5091_s3, 256, %s4110_s8, [#allocation9], %s5067_s14, %s5067_s14, %s5069_s15  }
  0x39   : > { %s5121_s10 = smov (%p4126_p4, %s44_s10), 0  ;;  %p5092_p3 = scmp.lt.s32.totalorder %s3990_s23, 2 }
  0x3a   : > { %s268_s7 = sand.u32 1, %s3990_s23   ;;  %s48_s13 = ssub.s32 %s3986_s22, %s5121_s10 }
  0x3b   : > { %p4168_p7 = pnand %p5092_p3, %p4086_p5  ;;  %p51_p8 = scmp.eq.s32.totalorder %s48_s13, 0 }
  0x3c   : > { %s3160_s26 = sshll.u32 %s4124_s11, 8  ;;  %s3279_s30 = sshll.u32 %s3986_s22, 12 }
  0x3d   : > { %s5093_s25 = scalar_select %p4168_p7, 1, 0 }
  0x3e   : > { %s5094_s18 = sadd.s32 1, %s3978_s20  ;;  %s5095_s1 = sld [smem:[#allocation18_spill]] }
  0x3f   : > { %s4180_s5 = scalar_select %p51_p8, %s3978_s20, %s5094_s18  }
  0x40   : > { %s272_s27 = scalar_lea.vmem [#allocation5], %s3160_s26  ;;  %s3995_s14 = smov [#allocation10]  }
  0x41   : > { %s280_s17 = sshll.u32 %s272_s27, 4  ;;  %s4189_s13 = sshll.u32 %s3995_s14, 4  ;;  %s4187_s17 = int_to_ptr.vmem [resolvable:$true] %s280_s17  ;;  %s233_s13 = int_to_ptr.vmem [resolvable:$true] %s4189_s13 }
  0x42   : > { %s4191_s15 = scalar_lea.sflag [#allocation6], %s268_s7  ;;  %p4197_p9 = pneg %p4168_p7 }
  0x44   : > { %s4185_s16 = scalar_lea.hbm %s5095_s1, %s3279_s30  ;;  %s3787_s12 = scalar_lea.hbm %s5095_s1, 8192 }
  0x45   : > { %s3782_s18 = scalar_lea.hbm %s4185_s16, 4096  ;;  %p3788_p1 = scmp.lt.u32.totalorder %s4185_s16, %s5095_s1 }
  0x46   : > { %p3783_p5 = scmp.ne.s32.totalorder %s4185_s16, %s3782_s18  ;;  %p3789_p4 = scmp.lt.u32.totalorder %s3787_s12, %s3782_s18 }
  0x47   : > { %s5096_s8 = scalar_select %p4197_p9, 1, 0 }
  0x48   : > { %p3785_p12 = pnand %p4197_p9, %p3783_p5  ;;  %p3790_p13 = por %p3789_p4, %p3788_p1 }
  0x49   : > { %p3791_p6 = scmp.lt.u32.totalorder %s3782_s18, %s4185_s16 }
  0x4a   : > { %p3786_p0 = pneg %p3785_p12 }
  0x4b   : > { %p3792_p11 = por %p3791_p6, %p3790_p13 }
  0x4d   : > { %p3793_p3 = pnand %p3792_p11, %p3786_p0 }
  0x4f   : > { %3796 = shalt.err (!%p3793_p3)
}
  0x50   : > { %s3797_s7 = scalar_lea.vmem %s4187_s17, 4096  ;;  %s3996_s26 = smov [#allocation5]  }
  0x51   : > { %p3798_p8 = scmp.ne.s32.totalorder %s4187_s17, %s3797_s7  ;;  %s3802_s30 = sshll.u32 %s3996_s26, 4  ;;  %s3803_s30 = int_to_ptr.vmem [resolvable:$false] %s3802_s30 }
  0x52   : > { %s3804_s27 = scalar_lea.vmem %s3803_s30, 8192  ;;  %p3805_p10 = scmp.lt.s32.totalorder %s4187_s17, %s3803_s30 }
  0x53   : > { %p3800_p5 = pnand %p3798_p8, %p4197_p9  ;;  %p3806_p2 = scmp.lt.s32.totalorder %s3804_s27, %s3797_s7 }
  0x55   : > { %p3801_p12 = pneg %p3800_p5  ;;  %p3807_p1 = por %p3806_p2, %p3805_p10 }
  0x57   : > { %p3808_p4 = pnand %p3807_p1, %p3801_p12 }
  0x59   : > { %3811 = shalt.err (!%p3808_p4)
}
  0x5a   : > { %s5097_s18 = smov 4   ;;  %s5098_s12 = smov 64  }
  0x5b   : > { %3603 = dma.hbm_to_vmem [thread:$0]  (!%p4168_p7), %s4185_s16, 4096, %s4187_s17, %s4191_s15, %s5098_s12, %s5098_s12, %s5097_s18  }
  0x5c   : > { %s5099_s4 = sld [smem:[#allocation20_spill]]  ;;  %p5100_p10 = scmp.ne.s32.totalorder %s5089_s9, 0 }
  0x5e   : > { %p5101_p0 = pneg %p5100_p10 }
  0x62   : > { %s3812_s30 = scalar_lea.hbm %s5099_s4, 256 }
  0x63   : > { %p3813_p2 = scmp.ne.s32.totalorder %s5099_s4, %s3812_s30  ;;  %p3819_p11 = scmp.lt.u32.totalorder %s3812_s30, %s5099_s4 }
  0x65   : > { %p3815_p13 = pnand %p3813_p2, %p5101_p0 }
  0x67   : > { %p3816_p6 = pneg %p3815_p13 }
  0x69   : > { %p3821_p3 = pnand %p3819_p11, %p3816_p6 }
  0x6b   : > { %3824 = shalt.err (!%p3821_p3)
}
  0x6c   : > { %s3825_s16 = scalar_lea.vmem %s233_s13, 256  ;;  %p5102_p5 = pmov %p5101_p0 }
  0x6d   : > { %p3826_p8 = scmp.ne.s32.totalorder %s233_s13, %s3825_s16  ;;  %p3833_p4 = scmp.lt.s32.totalorder %s233_s13, %s233_s13 }
  0x6e   : > { %p3834_p7 = scmp.lt.s32.totalorder %s3825_s16, %s3825_s16 }
  0x6f   : > { %p3828_p12 = pnand %p3826_p8, %p5102_p5 }
  0x70   : > { %p3835_p9 = por %p3834_p7, %p3833_p4 }
  0x71   : > { %p3829_p1 = pneg %p3828_p12 }
  0x73   : > { %p3836_p0 = pnand %p3835_p9, %p3829_p1 }
  0x75   : > { %3839 = shalt.err (!%p3836_p0)
}
  0x76   : > { %3596 = dma.hbm_to_vmem [thread:$0]  (!%p5100_p10), %s5099_s4, 256, %s233_s13, [#allocation9], %s5098_s12, %s5098_s12, %s5097_s18  }
  0x77   : > { %s3157_s17 = sshll.u32 %s4124_s11, 7  ;;  %s3278_s14 = sshll.u32 %s3986_s22, 11 }
  0x78   : > { %s4253_s7 = scalar_lea.hbm %s5054_s0, %s3278_s14  ;;  %s250_s9 = scalar_lea.vmem [#allocation2], %s3157_s17 }
  0x79   : > { %s258_s27 = sshll.u32 %s250_s9, 4  ;;  %s3163_s16 = sshll.u32 %s4124_s11, 6  ;;  %s4256_s27 = int_to_ptr.vmem [resolvable:$true] %s258_s27 }
  0x7a   : > { %s247_s1 = scalar_lea.sflag [#allocation3], %s4124_s11  ;;  %s3840_s3 = scalar_lea.hbm %s4253_s7, 2048 }
  0x7b   : > { %p3841_p7 = scmp.ne.s32.totalorder %s4253_s7, %s3840_s3  ;;  %p5103_p9 = scmp.ne.s32.totalorder %s5096_s8, 0 }
  0x7c   : > { %s3845_s14 = scalar_lea.hbm %s5054_s0, 4096  ;;  %p3846_p13 = scmp.lt.u32.totalorder %s4253_s7, %s5054_s0 }
  0x7d   : > { %p3843_p2 = pnand %p3841_p7, %p5103_p9  ;;  %p3847_p6 = scmp.lt.u32.totalorder %s3845_s14, %s3840_s3 }
  0x7e   : > { %p3849_p3 = scmp.lt.u32.totalorder %s3840_s3, %s4253_s7 }
  0x7f   : > { %p3844_p10 = pneg %p3843_p2  ;;  %p3848_p11 = por %p3847_p6, %p3846_p13 }
  0x81   : > { %p3850_p8 = por %p3849_p3, %p3848_p11 }
  0x83   : > { %p3851_p5 = pnand %p3850_p8, %p3844_p10 }
  0x85   : > { %3854 = shalt.err (!%p3851_p5)
}
  0x86   : > { %s3855_s17 = scalar_lea.vmem %s4256_s27, 2048  ;;  %s3997_s4 = smov [#allocation2]  }
  0x87   : > { %p3856_p12 = scmp.ne.s32.totalorder %s4256_s27, %s3855_s17  ;;  %s3860_s9 = sshll.u32 %s3997_s4, 4  ;;  %s3861_s9 = int_to_ptr.vmem [resolvable:$false] %s3860_s9 }
  0x88   : > { %s3862_s13 = scalar_lea.vmem %s3861_s9, 4096  ;;  %p3863_p0 = scmp.lt.s32.totalorder %s4256_s27, %s3861_s9 }
  0x89   : > { %p3858_p1 = pnand %p3856_p12, %p5103_p9  ;;  %p3864_p7 = scmp.lt.s32.totalorder %s3862_s13, %s3855_s17 }
  0x8b   : > { %p3859_p4 = pneg %p3858_p1  ;;  %p3865_p2 = por %p3864_p7, %p3863_p0 }
  0x8d   : > { %p3866_p13 = pnand %p3865_p2, %p3859_p4 }
  0x8f   : > { %3869 = shalt.err (!%p3866_p13)
}
  0x90   : > { %p5104_p10 = scmp.ne.s32.totalorder %s5093_s25, 0  ;;  %s3280_s3 = sshll.u32 %s3986_s22, 10 }
  0x91   : > { %s294_s14 = scalar_lea.vmem [#allocation7], %s3163_s16  ;;  %s4291_s4 = scalar_lea.hbm %s5056_s2, %s3280_s3 }
  0x92   : > { %3600 = dma.hbm_to_vmem [thread:$0]  (!%p5104_p10), %s4253_s7, 2048, %s4256_s27, %s247_s1, %s5098_s12, %s5098_s12, %s5097_s18  }
  0x93   : > { %s304_s26 = sshll.u32 %s294_s14, 4  ;;  %s3870_s9 = scalar_lea.hbm %s4291_s4, 1024  ;;  %s4293_s26 = int_to_ptr.vmem [resolvable:$true] %s304_s26 }
  0x94   : > { %p3871_p6 = scmp.ne.s32.totalorder %s4291_s4, %s3870_s9  ;;  %s3875_s12 = scalar_lea.hbm %s5056_s2, 2048 }
  0x95   : > { %p3876_p8 = scmp.lt.u32.totalorder %s4291_s4, %s5056_s2  ;;  %p3877_p5 = scmp.lt.u32.totalorder %s3875_s12, %s3870_s9 }
  0x96   : > { %p3873_p11 = pnand %p3871_p6, %p5103_p9  ;;  %p3879_p1 = scmp.lt.u32.totalorder %s3870_s9, %s4291_s4 }
  0x97   : > { %p3878_p12 = por %p3877_p5, %p3876_p8 }
  0x98   : > { %p3874_p3 = pneg %p3873_p11 }
  0x99   : > { %p3880_p4 = por %p3879_p1, %p3878_p12 }
  0x9b   : > { %p3881_p0 = pnand %p3880_p4, %p3874_p3 }
  0x9d   : > { %3884 = shalt.err (!%p3881_p0)
}
  0x9e   : > { %s3885_s16 = scalar_lea.vmem %s4293_s26, 1024  ;;  %s3998_s1 = smov [#allocation7]  }
  0x9f   : > { %p3886_p7 = scmp.ne.s32.totalorder %s4293_s26, %s3885_s16  ;;  %s3890_s13 = sshll.u32 %s3998_s1, 4  ;;  %s3891_s13 = int_to_ptr.vmem [resolvable:$false] %s3890_s13 }
  0xa0   : > { %s3892_s3 = scalar_lea.vmem %s3891_s13, 2048  ;;  %p3893_p6 = scmp.lt.s32.totalorder %s4293_s26, %s3891_s13 }
  0xa1   : > { %p3888_p2 = pnand %p3886_p7, %p5103_p9  ;;  %p3894_p11 = scmp.lt.s32.totalorder %s3892_s3, %s3885_s16 }
  0xa3   : > { %p3889_p13 = pneg %p3888_p2  ;;  %p3895_p8 = por %p3894_p11, %p3893_p6 }
  0xa5   : > { %p3896_p5 = pnand %p3895_p8, %p3889_p13 }
  0xa7   : > { %3899 = shalt.err (!%p3896_p5)
}
  0xa8   : > { %s3999_s14 = smov 128   ;;  %s4000_s30 = smov 8  }
  0xa9   : > { %3606 = dma.hbm_to_vmem [thread:$0]  (!%p5104_p10), %s4291_s4, 1024, %s4293_s26, %s4191_s15, %s3999_s14, %s3999_s14, %s4000_s30  }
  0xaa   : > { %p5105_p9 = scmp.ne.s32.totalorder %s5088_s6, 0 }
  0xab   : > { %s4320_s8 = sand.u32 (!%p5105_p9), 1, %s3974_s19   ;;  %p5106_p3 = scmp.ne.s32.totalorder (!%p5105_p9), %s5084_s28, 0 }
  0xac   : > { %316 = sbr.rel (%p5105_p9) target bundleno = 1157 (0x485), region = 40  ;;  %s3167_s17 = sshll.u32 (!%p5105_p9), %s4320_s8, 7 }
  0xad   : > { %s319_s9 = scalar_lea.sflag (!%p5105_p9), [#allocation3], %s4320_s8  ;;  %s4324_s18 = scalar_lea.vmem (!%p5105_p9), [#allocation2], %s3167_s17 }
  0xb3   : > { %3953 = dma.done.wait (%p5106_p3), %s319_s9, 2048  }
  0xb4   : > { %3955 = vsyncadd (%p5106_p3), %s319_s9, 4294965248  ;;  %s327_s6 = sand.u32 1, %s4075_s24   ;;  %s3168_s15 = sshll.u32 %s4320_s8, 8 }
  0xb5   : > { %s328_s25 = scalar_lea.sflag [#allocation6], %s327_s6  ;;  %s4332_s26 = scalar_lea.vmem [#allocation5], %s3168_s15 }
  0xb6   : > { %3957 = dma.done.wait (%p5106_p3), %s328_s25, 5120  }
  0xb7   : > { %3959 = vsyncadd (%p5106_p3), %s328_s25, 4294962176  ;;  %s3169_s4 = sshll.u32 %s4320_s8, 6  ;;  %p5107_p10 = scmp.eq.s32.totalorder %s4075_s24, 0 }
  0xb8   : > { %s4341_s11 = scalar_lea.vmem [#allocation7], %s3169_s4 }
  0xb9   : > { %3961 = dma.done.wait (%p5107_p10), [#allocation9], 512   ;;  %p5108_p12 = pmov %p5107_p10 }
  0xba   : > { %v4001_v0 = vmov 0.0   ;;  %vm4002_vm0 = vmmov 0   ;;  %v3684_v1 = vld [vmem:[%s4332_s26] sm:$0xff]   ;;  %v3685_v2 = vld [vmem:[%s4332_s26 + $0x8] sm:$0xff]   ;;  %vm490_vm1 = vcmask 130048   ;;  %v3686_v5 = vld [vmem:[%s4332_s26 + $0x10] sm:$0xff]  }
  0xbb   : > { %3963 = vsyncadd (%p5108_p12), [#allocation9], 4294966784  ;;  %3358 = vmatprep.subr.bf16.mxu0 %v4001_v0  ;;  %3364 = vmatprep.subr.bf16.mxu1 %v4001_v0  ;;  %v388_v3 = vld [vmem:[%s4324_s18] sm:$0xf]  ;;  %v389_v4 = vld [vmem:[%s4324_s18 + $0x4] sm:$0xf] }
  0xbc   : > { %3360 = vmatprep.mubr.msk.bf16.mxu0 %vm4002_vm0, %v4001_v0  ;;  %3366 = vmatprep.mubr.msk.bf16.mxu1 %vm4002_vm0, %v4001_v0  ;;  %v3687_v6 = vld [vmem:[%s4332_s26 + $0x18] sm:$0xff]   ;;  %v390_v7 = vld [vmem:[%s4324_s18 + $0x8] sm:$0xf]  ;;  %v391_v8 = vld [vmem:[%s4324_s18 + $0xc] sm:$0xf]  ;;  %vm2053_vm2 = vcmask 64512  }
  0xbd   : > { %3359 = vmatpush3.bf16.msra.mxu0 %v3684_v1  ;;  %3365 = vmatpush3.bf16.msra.mxu1 %v3685_v2  ;;  %v3688_v9 = vld [vmem:[%s4332_s26 + $0x20] sm:$0xff]   ;;  %v3689_v10 = vld [vmem:[%s4332_s26 + $0x28] sm:$0xff]   ;;  %v392_v11 = vld [vmem:[%s4324_s18 + $0x10] sm:$0xf]  ;;  %s4005_s24 = smov 32   ;;  %s4006_s28 = smov 16  }
  0xbe   : > { %3370 = vmatprep.subr.bf16.mxu0 %v4001_v0  ;;  %3376 = vmatprep.subr.bf16.mxu1 %v4001_v0  ;;  %v393_v12 = vld [vmem:[%s4324_s18 + $0x14] sm:$0xf]  ;;  %v3691_v14 = vld [vmem:[%s4332_s26 + $0x38] sm:$0xff]   ;;  %v3692_v17 = vld [vmem:[%s4332_s26 + $0x40] sm:$0xff]   ;;  %s4007_s12 = smov 48   ;;  %s4008_s7 = smov 8  }
  0xbf   : > { %v3690_v13 = vld [vmem:[%s4332_s26 + $0x30] sm:$0xff]   ;;  %v394_v15 = vld [vmem:[%s4324_s18 + $0x18] sm:$0xf]  ;;  %v395_v16 = vld [vmem:[%s4324_s18 + $0x1c] sm:$0xf]  ;;  %s4009_s27 = smov 24  }
  0xc0   : > { %3361 = vmatmul.mubr.msk.bf16.vlgmr.msra.gmra.mrb[0].mxu0 %vm490_vm1, %v388_v3  ;;  %3367 = vmatmul.mubr.msk.bf16.vlgmr.msra.gmra.mrb[0].mxu1 %vm490_vm1, %v389_v4  ;;  %v3693_v18 = vld [vmem:[%s4332_s26 + $0x48] sm:$0xff]   ;;  %v396_v19 = vld [vmem:[%s4324_s18 + $0x20] sm:$0xf]  ;;  %v397_v20 = vld [vmem:[%s4324_s18 + $0x24] sm:$0xf]  ;;  %s4010_s16 = smov 40  }
  0xc1   : > { %3371 = vmatpush3.bf16.msra.mxu0 %v3686_v5  ;;  %3377 = vmatpush3.bf16.msra.mxu1 %v3687_v6  ;;  %v3694_v21 = vld [vmem:[%s4332_s26 + $0x50] sm:$0xff]   ;;  %v3695_v22 = vld [vmem:[%s4332_s26 + $0x58] sm:$0xff]   ;;  %v398_v23 = vld [vmem:[%s4324_s18 + $0x28] sm:$0xf]  ;;  %s4011_s1 = smov 56   ;;  %vm2671_vm3 = vcmask 195584  }
  0xc2   : > { %3372 = vmatprep.mubr.msk.bf16.mxu0 %vm4002_vm0, %v4001_v0  ;;  %3378 = vmatprep.mubr.msk.bf16.mxu1 %vm4002_vm0, %v4001_v0  ;;  %v399_v24 = vld [vmem:[%s4324_s18 + $0x2c] sm:$0xf]  ;;  %v3696_v25 = vld [vmem:[%s4332_s26 + $0x60] sm:$0xff]   ;;  %v400_v27 = vld [vmem:[%s4324_s18 + $0x30] sm:$0xf]  ;;  %vm2676_vm4 = vcmask 261120  }
  0xc3   : > { %3382 = vmatprep.subr.bf16.mxu0 %v4001_v0  ;;  %3388 = vmatprep.subr.bf16.mxu1 %v4001_v0  ;;  %v3697_v26 = vld [vmem:[%s4332_s26 + $0x68] sm:$0xff]   ;;  %v3698_v28 = vld [vmem:[%s4332_s26 + $0x70] sm:$0xff]   ;;  %v3699_v30 = vld [vmem:[%s4332_s26 + $0x78] sm:$0xff]   ;;  %vm2681_vm5 = vcmask 326656   ;;  %vm2686_vm6 = vcmask 392192   ;;  %vm2691_vm7 = vcmask 457728  }
  0xc4   : > { %v401_v29 = vld [vmem:[%s4324_s18 + $0x34] sm:$0xf]  ;;  %v402_v31 = vld [vmem:[%s4324_s18 + $0x38] sm:$0xf]  ;;  %v3700_v32 = vld [vmem:[%s4332_s26 + $0x80] sm:$0xff]   ;;  %s384_s13 = scalar_lea.vmem [#allocation11], %s3169_s4 }
  0xc5   : > { %v403_v33 = vld [vmem:[%s4324_s18 + $0x3c] sm:$0xf]  ;;  %v3701_v34 = vld [vmem:[%s4332_s26 + $0x88] sm:$0xff]   ;;  %v404_v35 = vld [vmem:[%s4324_s18 + $0x40] sm:$0xf]  ;;  %s3281_s3 = sshll.u32 %s3982_s21, 10 }
  0xc6   : > { %v3702_v36 = vld [vmem:[%s4332_s26 + $0x90] sm:$0xff]   ;;  %v405_v37 = vld [vmem:[%s4324_s18 + $0x44] sm:$0xf]  ;;  %v3703_v38 = vld [vmem:[%s4332_s26 + $0x98] sm:$0xff]   ;;  %s2993_s14 = sshll.u32 %s384_s13, 4  ;;  %s5109_s9 = sld [smem:[#allocation21_spill]]  ;;  %s5002_s14 = int_to_ptr.vmem [resolvable:$true] %s2993_s14 }
  0xc7   : > { %v406_v39 = vld [vmem:[%s4324_s18 + $0x48] sm:$0xf]  ;;  %v3704_v40 = vld [vmem:[%s4332_s26 + $0xa0] sm:$0xff]   ;;  %v407_v41 = vld [vmem:[%s4324_s18 + $0x4c] sm:$0xf]  ;;  %s2977_s21 = scalar_lea.sflag [#allocation4], %s4320_s8 }
  0xc8   : > { %3373 = vmatmul.mubr.msk.bf16.vlgmr.msra.gmra.mrb[4].mxu0 %vm490_vm1, %v390_v7  ;;  %3379 = vmatmul.mubr.msk.bf16.vlgmr.msra.gmra.mrb[4].mxu1 %vm490_vm1, %v391_v8  ;;  %v3705_v42 = vld [vmem:[%s4332_s26 + $0xa8] sm:$0xff]   ;;  %v408_v43 = vld [vmem:[%s4324_s18 + $0x50] sm:$0xf]  ;;  %v409_v45 = vld [vmem:[%s4324_s18 + $0x54] sm:$0xf]  ;;  %s3900_s6 = scalar_lea.vmem %s5002_s14, 1024 }
  0xc9   : > { %3383 = vmatpush3.bf16.msra.mxu0 %v3688_v9  ;;  %3389 = vmatpush3.bf16.msra.mxu1 %v3689_v10  ;;  %v3706_v44 = vld [vmem:[%s4332_s26 + $0xb0] sm:$0xff]   ;;  %v3707_v46 = vld [vmem:[%s4332_s26 + $0xb8] sm:$0xff]   ;;  %v3708_v48 = vld [vmem:[%s4332_s26 + $0xc0] sm:$0xff]   ;;  %p3901_p1 = scmp.ne.s32.totalorder %s5002_s14, %s3900_s6  ;;  %p5110_p4 = scmp.ne.s32.totalorder %s5085_s29, 0 }
  0xca   : > { %3384 = vmatprep.mubr.msk.bf16.mxu0 %vm4002_vm0, %v4001_v0  ;;  %3390 = vmatprep.mubr.msk.bf16.mxu1 %vm4002_vm0, %v4001_v0  ;;  %v410_v47 = vld [vmem:[%s4324_s18 + $0x58] sm:$0xf]  ;;  %v411_v49 = vld [vmem:[%s4324_s18 + $0x5c] sm:$0xf]  ;;  %v3709_v50 = vld [vmem:[%s4332_s26 + $0xc8] sm:$0xff]   ;;  %s4012_s15 = smov [#allocation11]  }
  0xcb   : > { %3394 = vmatprep.subr.bf16.mxu0 %v4001_v0  ;;  %3400 = vmatprep.subr.bf16.mxu1 %v4001_v0  ;;  %v412_v51 = vld [vmem:[%s4324_s18 + $0x60] sm:$0xf]  ;;  %v3710_v52 = vld [vmem:[%s4332_s26 + $0xd0] sm:$0xff]   ;;  %v413_v53 = vld [vmem:[%s4324_s18 + $0x64] sm:$0xf]  ;;  %p3902_p0 = pnand %p3901_p1, %p5110_p4  ;;  %s3904_s25 = sshll.u32 %s4012_s15, 4  ;;  %s3905_s25 = int_to_ptr.vmem [resolvable:$false] %s3904_s25 }
  0xcc   : > { %v3711_v54 = vld [vmem:[%s4332_s26 + $0xd8] sm:$0xff]   ;;  %v414_v55 = vld [vmem:[%s4324_s18 + $0x68] sm:$0xf]  ;;  %v3712_v56 = vld [vmem:[%s4332_s26 + $0xe0] sm:$0xff]   ;;  %p3907_p2 = scmp.lt.s32.totalorder %s5002_s14, %s3905_s25 }
  0xcd   : > { %v415_v57 = vld [vmem:[%s4324_s18 + $0x6c] sm:$0xf]  ;;  %v416_v59 = vld [vmem:[%s4324_s18 + $0x70] sm:$0xf]  ;;  %v417_v61 = vld [vmem:[%s4324_s18 + $0x74] sm:$0xf]  ;;  %p3903_p7 = pneg %p3902_p0 }
  0xce   : > { %v3713_v58 = vld [vmem:[%s4332_s26 + $0xe8] sm:$0xff]   ;;  %v3714_v60 = vld [vmem:[%s4332_s26 + $0xf0] sm:$0xff]   ;;  %v3715_v62 = vld [vmem:[%s4332_s26 + $0xf8] sm:$0xff]   ;;  %s3906_s26 = scalar_lea.vmem %s3905_s25, 2048 }
  0xcf   : > { %v418_v63 = vld [vmem:[%s4324_s18 + $0x78] sm:$0xf]  ;;  %v419_v1 = vld [vmem:[%s4324_s18 + $0x7c] sm:$0xf]  ;;  %s4998_s18 = scalar_lea.hbm %s5109_s9, %s3281_s3  ;;  %p3908_p13 = scmp.lt.s32.totalorder %s3906_s26, %s3900_s6 }
  0xd0   : > { %3385 = vmatmul.mubr.msk.bf16.vlgmr.msra.gmra.mrb[8].mxu0 %vm490_vm1, %v392_v11  ;;  %3391 = vmatmul.mubr.msk.bf16.vlgmr.msra.gmra.mrb[8].mxu1 %vm490_vm1, %v393_v12 }
  0xd1   : > { %3395 = vmatpush3.bf16.msra.mxu0 %v3690_v13  ;;  %3401 = vmatpush3.bf16.msra.mxu1 %v3691_v14  ;;  %p3909_p6 = por %p3908_p13, %p3907_p2 }
  0xd2   : > { %3396 = vmatprep.mubr.msk.bf16.mxu0 %vm4002_vm0, %v4001_v0  ;;  %3402 = vmatprep.mubr.msk.bf16.mxu1 %vm4002_vm0, %v4001_v0 }
  0xd3   : > { %3406 = vmatprep.subr.bf16.mxu0 %v4001_v0  ;;  %3412 = vmatprep.subr.bf16.mxu1 %v4001_v0  ;;  %p3910_p11 = pnand %p3909_p6, %p3903_p7 }
  0xd8   : > { %3397 = vmatmul.mubr.msk.bf16.vlgmr.msra.gmra.mrb[12].mxu0 %vm490_vm1, %v394_v15  ;;  %3403 = vmatmul.mubr.msk.bf16.vlgmr.msra.gmra.mrb[12].mxu1 %vm490_vm1, %v395_v16 }
  0xd9   : > { %3407 = vmatpush3.bf16.msra.mxu0 %v3692_v17  ;;  %3413 = vmatpush3.bf16.msra.mxu1 %v3693_v18 }
  0xda   : > { %3408 = vmatprep.mubr.msk.bf16.mxu0 %vm4002_vm0, %v4001_v0  ;;  %3414 = vmatprep.mubr.msk.bf16.mxu1 %vm4002_vm0, %v4001_v0 }
  0xdb   : > { %3418 = vmatprep.subr.bf16.mxu0 %v4001_v0  ;;  %3424 = vmatprep.subr.bf16.mxu1 %v4001_v0 }
  0xe0   : > { %3409 = vmatmul.mubr.msk.bf16.vlgmr.msra.gmra.mrb[16].mxu0 %vm490_vm1, %v396_v19  ;;  %3415 = vmatmul.mubr.msk.bf16.vlgmr.msra.gmra.mrb[16].mxu1 %vm490_vm1, %v397_v20 }
  0xe1   : > { %3419 = vmatpush3.bf16.msra.mxu0 %v3694_v21  ;;  %3425 = vmatpush3.bf16.msra.mxu1 %v3695_v22 }
  0xe2   : > { %3420 = vmatprep.mubr.msk.bf16.mxu0 %vm4002_vm0, %v4001_v0  ;;  %3426 = vmatprep.mubr.msk.bf16.mxu1 %vm4002_vm0, %v4001_v0 }
  0xe3   : > { %3430 = vmatprep.subr.bf16.mxu0 %v4001_v0  ;;  %3436 = vmatprep.subr.bf16.mxu1 %v4001_v0 }
  0xe8   : > { %3421 = vmatmul.mubr.msk.bf16.vlgmr.msra.gmra.mrb[20].mxu0 %vm490_vm1, %v398_v23  ;;  %3427 = vmatmul.mubr.msk.bf16.vlgmr.msra.gmra.mrb[20].mxu1 %vm490_vm1, %v399_v24 }
  0xe9   : > { %3431 = vmatpush3.bf16.msra.mxu0 %v3696_v25  ;;  %3437 = vmatpush3.bf16.msra.mxu1 %v3697_v26 }
  0xea   : > { %3432 = vmatprep.mubr.msk.bf16.mxu0 %vm4002_vm0, %v4001_v0  ;;  %3438 = vmatprep.mubr.msk.bf16.mxu1 %vm4002_vm0, %v4001_v0 }
  0xeb   : > { %3442 = vmatprep.subr.bf16.mxu0 %v4001_v0  ;;  %3448 = vmatprep.subr.bf16.mxu1 %v4001_v0 }
  0xf0   : > { %3433 = vmatmul.mubr.msk.bf16.vlgmr.msra.gmra.mrb[24].mxu0 %vm490_vm1, %v400_v27  ;;  %3439 = vmatmul.mubr.msk.bf16.vlgmr.msra.gmra.mrb[24].mxu1 %vm490_vm1, %v401_v29 }
  0xf1   : > { %3443 = vmatpush3.bf16.msra.mxu0 %v3698_v28  ;;  %3449 = vmatpush3.bf16.msra.mxu1 %v3699_v30 }
  0xf2   : > { %3444 = vmatprep.mubr.msk.bf16.mxu0 %vm4002_vm0, %v4001_v0  ;;  %3450 = vmatprep.mubr.msk.bf16.mxu1 %vm4002_vm0, %v4001_v0 }
  0xf3   : > { %3454 = vmatprep.subr.bf16.mxu0 %v4001_v0  ;;  %3460 = vmatprep.subr.bf16.mxu1 %v4001_v0 }
  0xf8   : > { %3445 = vmatmul.mubr.msk.bf16.vlgmr.msra.gmra.mrb[28].mxu0 %vm490_vm1, %v402_v31  ;;  %3451 = vmatmul.mubr.msk.bf16.vlgmr.msra.gmra.mrb[28].mxu1 %vm490_vm1, %v403_v33 }
  0xf9   : > { %3455 = vmatpush3.bf16.msra.mxu0 %v3700_v32  ;;  %3461 = vmatpush3.bf16.msra.mxu1 %v3701_v34 }
  0xfa   : > { %3456 = vmatprep.mubr.msk.bf16.mxu0 %vm4002_vm0, %v4001_v0  ;;  %3462 = vmatprep.mubr.msk.bf16.mxu1 %vm4002_vm0, %v4001_v0 }
  0xfb   : > { %3466 = vmatprep.subr.bf16.mxu0 %v4001_v0  ;;  %3472 = vmatprep.subr.bf16.mxu1 %v4001_v0 }
 0x100   : > { %3457 = vmatmul.mubr.msk.bf16.vlgmr.msra.gmra.mrb[32].mxu0 %vm490_vm1, %v404_v35  ;;  %3463 = vmatmul.mubr.msk.bf16.vlgmr.msra.gmra.mrb[32].mxu1 %vm490_vm1, %v405_v37 }
 0x101   : > { %3467 = vmatpush3.bf16.msra.mxu0 %v3702_v36  ;;  %3473 = vmatpush3.bf16.msra.mxu1 %v3703_v38 }
 0x102   : > { %3468 = vmatprep.mubr.msk.bf16.mxu0 %vm4002_vm0, %v4001_v0  ;;  %3474 = vmatprep.mubr.msk.bf16.mxu1 %vm4002_vm0, %v4001_v0 }
 0x103   : > { %3478 = vmatprep.subr.bf16.mxu0 %v4001_v0  ;;  %3484 = vmatprep.subr.bf16.mxu1 %v4001_v0 }
 0x108   : > { %3469 = vmatmul.mubr.msk.bf16.vlgmr.msra.gmra.mrb[36].mxu0 %vm490_vm1, %v406_v39  ;;  %3475 = vmatmul.mubr.msk.bf16.vlgmr.msra.gmra.mrb[36].mxu1 %vm490_vm1, %v407_v41 }
 0x109   : > { %3479 = vmatpush3.bf16.msra.mxu0 %v3704_v40  ;;  %3485 = vmatpush3.bf16.msra.mxu1 %v3705_v42 }
 0x10a   : > { %3480 = vmatprep.mubr.msk.bf16.mxu0 %vm4002_vm0, %v4001_v0  ;;  %3486 = vmatprep.mubr.msk.bf16.mxu1 %vm4002_vm0, %v4001_v0 }
 0x10b   : > { %3490 = vmatprep.subr.bf16.mxu0 %v4001_v0  ;;  %3496 = vmatprep.subr.bf16.mxu1 %v4001_v0 }
 0x110   : > { %3481 = vmatmul.mubr.msk.bf16.vlgmr.msra.gmra.mrb[40].mxu0 %vm490_vm1, %v408_v43  ;;  %3487 = vmatmul.mubr.msk.bf16.vlgmr.msra.gmra.mrb[40].mxu1 %vm490_vm1, %v409_v45 }
 0x111   : > { %3491 = vmatpush3.bf16.msra.mxu0 %v3706_v44  ;;  %3497 = vmatpush3.bf16.msra.mxu1 %v3707_v46 }
 0x112   : > { %3492 = vmatprep.mubr.msk.bf16.mxu0 %vm4002_vm0, %v4001_v0  ;;  %3498 = vmatprep.mubr.msk.bf16.mxu1 %vm4002_vm0, %v4001_v0 }
 0x113   : > { %3502 = vmatprep.subr.bf16.mxu0 %v4001_v0  ;;  %3508 = vmatprep.subr.bf16.mxu1 %v4001_v0 }
 0x118   : > { %3493 = vmatmul.mubr.msk.bf16.vlgmr.msra.gmra.mrb[44].mxu0 %vm490_vm1, %v410_v47  ;;  %3499 = vmatmul.mubr.msk.bf16.vlgmr.msra.gmra.mrb[44].mxu1 %vm490_vm1, %v411_v49 }
 0x119   : > { %3503 = vmatpush3.bf16.msra.mxu0 %v3708_v48  ;;  %3509 = vmatpush3.bf16.msra.mxu1 %v3709_v50 }
 0x11a   : > { %3504 = vmatprep.mubr.msk.bf16.mxu0 %vm4002_vm0, %v4001_v0  ;;  %3510 = vmatprep.mubr.msk.bf16.mxu1 %vm4002_vm0, %v4001_v0 }
 0x11b   : > { %3514 = vmatprep.subr.bf16.mxu0 %v4001_v0  ;;  %3520 = vmatprep.subr.bf16.mxu1 %v4001_v0 }
 0x120   : > { %3505 = vmatmul.mubr.msk.bf16.vlgmr.msra.gmra.mrb[48].mxu0 %vm490_vm1, %v412_v51  ;;  %3511 = vmatmul.mubr.msk.bf16.vlgmr.msra.gmra.mrb[48].mxu1 %vm490_vm1, %v413_v53 }
 0x121   : > { %3515 = vmatpush3.bf16.msra.mxu0 %v3710_v52  ;;  %3521 = vmatpush3.bf16.msra.mxu1 %v3711_v54 }
 0x122   : > { %3516 = vmatprep.mubr.msk.bf16.mxu0 %vm4002_vm0, %v4001_v0  ;;  %3522 = vmatprep.mubr.msk.bf16.mxu1 %vm4002_vm0, %v4001_v0 }
 0x123   : > { %3526 = vmatprep.subr.bf16.mxu0 %v4001_v0  ;;  %3532 = vmatprep.subr.bf16.mxu1 %v4001_v0 }
 0x128   : > { %3517 = vmatmul.mubr.msk.bf16.vlgmr.msra.gmra.mrb[52].mxu0 %vm490_vm1, %v414_v55  ;;  %3523 = vmatmul.mubr.msk.bf16.vlgmr.msra.gmra.mrb[52].mxu1 %vm490_vm1, %v415_v57 }
 0x129   : > { %3527 = vmatpush3.bf16.msra.mxu0 %v3712_v56  ;;  %3533 = vmatpush3.bf16.msra.mxu1 %v3713_v58 }
 0x12a   : > { %3528 = vmatprep.mubr.msk.bf16.mxu0 %vm4002_vm0, %v4001_v0  ;;  %3534 = vmatprep.mubr.msk.bf16.mxu1 %vm4002_vm0, %v4001_v0 }
 0x12b   : > { %3538 = vmatprep.subr.bf16.mxu0 %v4001_v0  ;;  %3544 = vmatprep.subr.bf16.mxu1 %v4001_v0 }
 0x130   : > { %3529 = vmatmul.mubr.msk.bf16.vlgmr.msra.gmra.mrb[56].mxu0 %vm490_vm1, %v416_v59  ;;  %3535 = vmatmul.mubr.msk.bf16.vlgmr.msra.gmra.mrb[56].mxu1 %vm490_vm1, %v417_v61 }
 0x131   : > { %3539 = vmatpush3.bf16.msra.mxu0 %v3714_v60  ;;  %3545 = vmatpush3.bf16.msra.mxu1 %v3715_v62 }
 0x132   : > { %3540 = vmatprep.mubr.msk.bf16.mxu0 %vm4002_vm0, %v4001_v0  ;;  %3546 = vmatprep.mubr.msk.bf16.mxu1 %vm4002_vm0, %v4001_v0 }
 0x138   : > { %3541 = vmatmul.mubr.msk.bf16.vlgmr.msra.gmra.mrb[60].mxu0 %vm490_vm1, %v418_v63  ;;  %3547 = vmatmul.mubr.msk.bf16.vlgmr.msra.gmra.mrb[60].mxu1 %vm490_vm1, %v419_v1 }
 0x193   : > { %v4539_v2 = vpop.f32.mrb[0].mxu0  ;;  %v4543_v4 = vpop.f32.mrb[0].mxu1 }
 0x194   : > { %v2054_v3 = vsel %vm2053_vm2, %v4539_v2, 0.0  ;;  %v3362_v5 = vpop.f32.mrb[1].mxu0  ;;  %v2055_v6 = vsel %vm2053_vm2, %v4543_v4, 0.0  ;;  %v3368_v7 = vpop.f32.mrb[1].mxu1 }
 0x195   : > { %v531_v0 = vpop.f32.mrb[2].mxu0  ;;  %v2056_v8 = vadd.f32 %v2055_v6, %v2054_v3  ;;  %v580_v9 = vpop.f32.mrb[2].mxu1 }
 0x196   : > { %v3363_v10 = vpop.f32.mrb[3].mxu0  ;;  %v3369_v11 = vpop.f32.mrb[3].mxu1 }
 0x19b   : > { %v4547_v12 = vpop.f32.mrb[4].mxu0  ;;  %v4551_v14 = vpop.f32.mrb[4].mxu1 }
 0x19c   : > { %v2057_v13 = vsel %vm2053_vm2, %v4547_v12, 0.0  ;;  %v3374_v15 = vpop.f32.mrb[5].mxu0  ;;  %v2059_v17 = vsel %vm2053_vm2, %v4551_v14, 0.0  ;;  %v3380_v18 = vpop.f32.mrb[5].mxu1 }
 0x19d   : > { %v2058_v16 = vadd.f32 %v2057_v13, %v2056_v8  ;;  %v629_v19 = vpop.f32.mrb[6].mxu0  ;;  %v678_v20 = vpop.f32.mrb[6].mxu1 }
 0x19e   : > { %v3375_v21 = vpop.f32.mrb[7].mxu0  ;;  %v3381_v23 = vpop.f32.mrb[7].mxu1 }
 0x19f   : > { %v2060_v22 = vadd.f32 %v2059_v17, %v2058_v16 }
 0x1a3   : > { %v4555_v24 = vpop.f32.mrb[8].mxu0  ;;  %v4559_v26 = vpop.f32.mrb[8].mxu1 }
 0x1a4   : > { %v2061_v25 = vsel %vm2053_vm2, %v4555_v24, 0.0  ;;  %v3386_v27 = vpop.f32.mrb[9].mxu0  ;;  %v2063_v29 = vsel %vm2053_vm2, %v4559_v26, 0.0  ;;  %v3392_v30 = vpop.f32.mrb[9].mxu1 }
 0x1a5   : > { %v2062_v28 = vadd.f32 %v2061_v25, %v2060_v22  ;;  %v727_v31 = vpop.f32.mrb[10].mxu0  ;;  %v776_v32 = vpop.f32.mrb[10].mxu1 }
 0x1a6   : > { %v3387_v33 = vpop.f32.mrb[11].mxu0  ;;  %v3393_v35 = vpop.f32.mrb[11].mxu1 }
 0x1a7   : > { %v2064_v34 = vadd.f32 %v2063_v29, %v2062_v28 }
 0x1ab   : > { %v4563_v36 = vpop.f32.mrb[12].mxu0  ;;  %v4567_v38 = vpop.f32.mrb[12].mxu1 }
 0x1ac   : > { %v2065_v37 = vsel %vm2053_vm2, %v4563_v36, 0.0  ;;  %v3398_v39 = vpop.f32.mrb[13].mxu0  ;;  %v2067_v41 = vsel %vm2053_vm2, %v4567_v38, 0.0  ;;  %v3404_v42 = vpop.f32.mrb[13].mxu1 }
 0x1ad   : > { %v2066_v40 = vadd.f32 %v2065_v37, %v2064_v34  ;;  %v825_v43 = vpop.f32.mrb[14].mxu0  ;;  %v874_v44 = vpop.f32.mrb[14].mxu1 }
 0x1ae   : > { %v3399_v45 = vpop.f32.mrb[15].mxu0  ;;  %v3405_v47 = vpop.f32.mrb[15].mxu1 }
 0x1af   : > { %v2068_v46 = vadd.f32 %v2067_v41, %v2066_v40 }
 0x1b3   : > { %v4571_v48 = vpop.f32.mrb[16].mxu0  ;;  %v4575_v50 = vpop.f32.mrb[16].mxu1 }
 0x1b4   : > { %v2069_v49 = vsel %vm2053_vm2, %v4571_v48, 0.0  ;;  %v3410_v51 = vpop.f32.mrb[17].mxu0  ;;  %v2071_v53 = vsel %vm2053_vm2, %v4575_v50, 0.0  ;;  %v3416_v54 = vpop.f32.mrb[17].mxu1 }
 0x1b5   : > { %v2070_v52 = vadd.f32 %v2069_v49, %v2068_v46  ;;  %v923_v55 = vpop.f32.mrb[18].mxu0  ;;  %v972_v56 = vpop.f32.mrb[18].mxu1 }
 0x1b6   : > { %v3411_v57 = vpop.f32.mrb[19].mxu0  ;;  %v3417_v59 = vpop.f32.mrb[19].mxu1 }
 0x1b7   : > { %v2072_v58 = vadd.f32 %v2071_v53, %v2070_v52 }
 0x1bb   : > { %v4579_v60 = vpop.f32.mrb[20].mxu0  ;;  %v4583_v62 = vpop.f32.mrb[20].mxu1 }
 0x1bc   : > { %v2073_v61 = vsel %vm2053_vm2, %v4579_v60, 0.0  ;;  %v3422_v63 = vpop.f32.mrb[21].mxu0  ;;  %v2075_v3 = vsel %vm2053_vm2, %v4583_v62, 0.0  ;;  %v3428_v5 = vpop.f32.mrb[21].mxu1 }
 0x1bd   : > { %v2074_v1 = vadd.f32 %v2073_v61, %v2072_v58  ;;  %v1021_v6 = vpop.f32.mrb[22].mxu0  ;;  %v1070_v7 = vpop.f32.mrb[22].mxu1 }
 0x1be   : > { %v3423_v0 = vpop.f32.mrb[23].mxu0  ;;  %v3429_v9 = vpop.f32.mrb[23].mxu1 }
 0x1bf   : > { %v2076_v8 = vadd.f32 %v2075_v3, %v2074_v1 }
 0x1c3   : > { %v4587_v10 = vpop.f32.mrb[24].mxu0  ;;  %v4591_v13 = vpop.f32.mrb[24].mxu1 }
 0x1c4   : > { %v2077_v11 = vsel %vm2053_vm2, %v4587_v10, 0.0  ;;  %v3434_v15 = vpop.f32.mrb[25].mxu0  ;;  %v2079_v17 = vsel %vm2053_vm2, %v4591_v13, 0.0  ;;  %v3440_v18 = vpop.f32.mrb[25].mxu1 }
 0x1c5   : > { %v2078_v16 = vadd.f32 %v2077_v11, %v2076_v8  ;;  %v1119_v19 = vpop.f32.mrb[26].mxu0  ;;  %v1168_v20 = vpop.f32.mrb[26].mxu1 }
 0x1c6   : > { %v3435_v21 = vpop.f32.mrb[27].mxu0  ;;  %v3441_v23 = vpop.f32.mrb[27].mxu1 }
 0x1c7   : > { %v2080_v22 = vadd.f32 %v2079_v17, %v2078_v16 }
 0x1cb   : > { %v4595_v25 = vpop.f32.mrb[28].mxu0  ;;  %v4599_v28 = vpop.f32.mrb[28].mxu1 }
 0x1cc   : > { %v2081_v27 = vsel %vm2053_vm2, %v4595_v25, 0.0  ;;  %v3446_v29 = vpop.f32.mrb[29].mxu0  ;;  %v2083_v31 = vsel %vm2053_vm2, %v4599_v28, 0.0  ;;  %v3452_v32 = vpop.f32.mrb[29].mxu1 }
 0x1cd   : > { %v2082_v30 = vadd.f32 %v2081_v27, %v2080_v22  ;;  %v1217_v33 = vpop.f32.mrb[30].mxu0  ;;  %v1266_v34 = vpop.f32.mrb[30].mxu1 }
 0x1ce   : > { %v3447_v35 = vpop.f32.mrb[31].mxu0  ;;  %v3453_v39 = vpop.f32.mrb[31].mxu1 }
 0x1cf   : > { %v2084_v37 = vadd.f32 %v2083_v31, %v2082_v30 }
 0x1d3   : > { %v4603_v40 = vpop.f32.mrb[32].mxu0  ;;  %v4607_v42 = vpop.f32.mrb[32].mxu1 }
 0x1d4   : > { %v2085_v41 = vsel %vm2053_vm2, %v4603_v40, 0.0  ;;  %v3458_v43 = vpop.f32.mrb[33].mxu0  ;;  %v2087_v45 = vsel %vm2053_vm2, %v4607_v42, 0.0  ;;  %v3464_v46 = vpop.f32.mrb[33].mxu1 }
 0x1d5   : > { %v2086_v44 = vadd.f32 %v2085_v41, %v2084_v37  ;;  %v1315_v47 = vpop.f32.mrb[34].mxu0  ;;  %v1364_v49 = vpop.f32.mrb[34].mxu1 }
 0x1d6   : > { %v3459_v51 = vpop.f32.mrb[35].mxu0  ;;  %v3465_v53 = vpop.f32.mrb[35].mxu1 }
 0x1d7   : > { %v2088_v52 = vadd.f32 %v2087_v45, %v2086_v44 }
 0x1db   : > { %v4611_v54 = vpop.f32.mrb[36].mxu0  ;;  %v4615_v56 = vpop.f32.mrb[36].mxu1 }
 0x1dc   : > { %v2089_v55 = vsel %vm2053_vm2, %v4611_v54, 0.0  ;;  %v3470_v57 = vpop.f32.mrb[37].mxu0  ;;  %v2091_v59 = vsel %vm2053_vm2, %v4615_v56, 0.0  ;;  %v3476_v61 = vpop.f32.mrb[37].mxu1 }
 0x1dd   : > { %v2090_v58 = vadd.f32 %v2089_v55, %v2088_v52  ;;  %v1413_v63 = vpop.f32.mrb[38].mxu0  ;;  %v1462_v1 = vpop.f32.mrb[38].mxu1 }
 0x1de   : > { %v3471_v3 = vpop.f32.mrb[39].mxu0  ;;  %v3477_v6 = vpop.f32.mrb[39].mxu1 }
 0x1df   : > { %v2092_v5 = vadd.f32 %v2091_v59, %v2090_v58 }
 0x1e3   : > { %v4619_v7 = vpop.f32.mrb[40].mxu0  ;;  %v4623_v8 = vpop.f32.mrb[40].mxu1 }
 0x1e4   : > { %v2093_v0 = vsel %vm2053_vm2, %v4619_v7, 0.0  ;;  %v3482_v9 = vpop.f32.mrb[41].mxu0  ;;  %v2095_v15 = vsel %vm2053_vm2, %v4623_v8, 0.0  ;;  %v3488_v16 = vpop.f32.mrb[41].mxu1 }
 0x1e5   : > { %v2094_v11 = vadd.f32 %v2093_v0, %v2092_v5  ;;  %v1511_v17 = vpop.f32.mrb[42].mxu0  ;;  %v1560_v18 = vpop.f32.mrb[42].mxu1 }
 0x1e6   : > { %v3483_v19 = vpop.f32.mrb[43].mxu0  ;;  %v3489_v21 = vpop.f32.mrb[43].mxu1 }
 0x1e7   : > { %v2096_v20 = vadd.f32 %v2095_v15, %v2094_v11 }
 0x1eb   : > { %v4627_v22 = vpop.f32.mrb[44].mxu0  ;;  %v4631_v27 = vpop.f32.mrb[44].mxu1 }
 0x1ec   : > { %v2097_v23 = vsel %vm2053_vm2, %v4627_v22, 0.0  ;;  %v3494_v29 = vpop.f32.mrb[45].mxu0  ;;  %v2099_v31 = vsel %vm2053_vm2, %v4631_v27, 0.0  ;;  %v3500_v32 = vpop.f32.mrb[45].mxu1 }
 0x1ed   : > { %v2098_v30 = vadd.f32 %v2097_v23, %v2096_v20  ;;  %v1609_v33 = vpop.f32.mrb[46].mxu0  ;;  %v1658_v34 = vpop.f32.mrb[46].mxu1 }
 0x1ee   : > { %v3495_v35 = vpop.f32.mrb[47].mxu0  ;;  %v3501_v39 = vpop.f32.mrb[47].mxu1 }
 0x1ef   : > { %v2100_v37 = vadd.f32 %v2099_v31, %v2098_v30 }
 0x1f3   : > { %v4635_v41 = vpop.f32.mrb[48].mxu0  ;;  %v4639_v44 = vpop.f32.mrb[48].mxu1 }
 0x1f4   : > { %v2101_v43 = vsel %vm2053_vm2, %v4635_v41, 0.0  ;;  %v3506_v45 = vpop.f32.mrb[49].mxu0  ;;  %v2103_v47 = vsel %vm2053_vm2, %v4639_v44, 0.0  ;;  %v3512_v49 = vpop.f32.mrb[49].mxu1 }
 0x1f5   : > { %v2102_v46 = vadd.f32 %v2101_v43, %v2100_v37  ;;  %v1707_v51 = vpop.f32.mrb[50].mxu0  ;;  %v1756_v52 = vpop.f32.mrb[50].mxu1 }
 0x1f6   : > { %v3507_v53 = vpop.f32.mrb[51].mxu0  ;;  %v3513_v57 = vpop.f32.mrb[51].mxu1 }
 0x1f7   : > { %v2104_v55 = vadd.f32 %v2103_v47, %v2102_v46 }
 0x1fb   : > { %v4643_v58 = vpop.f32.mrb[52].mxu0  ;;  %v1851_v61 = vpop.f32.mrb[52].mxu1 }
 0x1fc   : > { %v2105_v59 = vsel %vm2053_vm2, %v4643_v58, 0.0  ;;  %v3518_v63 = vpop.f32.mrb[53].mxu0  ;;  %v2107_v3 = vsel %vm2053_vm2, %v1851_v61, 0.0  ;;  %v3524_v5 = vpop.f32.mrb[53].mxu1 }
 0x1fd   : > { %v2106_v1 = vadd.f32 %v2105_v59, %v2104_v55  ;;  %v1805_v6 = vpop.f32.mrb[54].mxu0  ;;  %v1854_v0 = vpop.f32.mrb[54].mxu1 }
 0x1fe   : > { %v3519_v9 = vpop.f32.mrb[55].mxu0  ;;  %v3525_v15 = vpop.f32.mrb[55].mxu1 }
 0x1ff   : > { %v2108_v11 = vadd.f32 %v2107_v3, %v2106_v1 }
 0x203   : > { %v1900_v16 = vpop.f32.mrb[56].mxu0  ;;  %v1949_v18 = vpop.f32.mrb[56].mxu1 }
 0x204   : > { %v2109_v17 = vsel %vm2053_vm2, %v1900_v16, 0.0  ;;  %v3530_v19 = vpop.f32.mrb[57].mxu0  ;;  %v2111_v21 = vsel %vm2053_vm2, %v1949_v18, 0.0  ;;  %v3536_v23 = vpop.f32.mrb[57].mxu1 }
 0x205   : > { %v2110_v20 = vadd.f32 %v2109_v17, %v2108_v11  ;;  %v1903_v29 = vpop.f32.mrb[58].mxu0  ;;  %v1952_v30 = vpop.f32.mrb[58].mxu1 }
 0x206   : > { %v3531_v31 = vpop.f32.mrb[59].mxu0  ;;  %v3537_v33 = vpop.f32.mrb[59].mxu1 }
 0x207   : > { %v2112_v32 = vadd.f32 %v2111_v21, %v2110_v20 }
 0x20b   : > { %v1998_v34 = vpop.f32.mrb[60].mxu0  ;;  %v2047_v37 = vpop.f32.mrb[60].mxu1 }
 0x20c   : > { %v2113_v35 = vsel %vm2053_vm2, %v1998_v34, 0.0  ;;  %v3542_v39 = vpop.f32.mrb[61].mxu0  ;;  %v2115_v45 = vsel %vm2053_vm2, %v2047_v37, 0.0  ;;  %v3548_v46 = vpop.f32.mrb[61].mxu1 }
 0x20d   : > { %v2114_v43 = vadd.f32 %v2113_v35, %v2112_v32  ;;  %v2001_v47 = vpop.f32.mrb[62].mxu0  ;;  %v2050_v49 = vpop.f32.mrb[62].mxu1 }
 0x20e   : > { %v3543_v51 = vpop.f32.mrb[63].mxu0  ;;  %v3549_v53 = vpop.f32.mrb[63].mxu1 }
 0x20f   : > { %v2116_v52 = vadd.f32 %v2115_v45, %v2114_v43 }
 0x211   : > { %v2118_v55 = vmul.f32 0.03125, %v2116_v52 }
 0x213   : > { %v4653_v57 = vsub.f32 %v4539_v2, %v2118_v55  ;;  %v4656_v59 = vsub.f32 %v4543_v4, %v2118_v55  ;;  %v4659_v63 = vsub.f32 %v4547_v12, %v2118_v55  ;;  %v4662_v1 = vsub.f32 %v4551_v14, %v2118_v55 }
 0x214   : > { %v4665_v3 = vsub.f32 %v4555_v24, %v2118_v55  ;;  %v4668_v5 = vsub.f32 %v4559_v26, %v2118_v55  ;;  %v4671_v6 = vsub.f32 %v4563_v36, %v2118_v55  ;;  %v4674_v2 = vsub.f32 %v4567_v38, %v2118_v55 }
 0x215   : > { %v4677_v4 = vsub.f32 %v4571_v48, %v2118_v55  ;;  %v4680_v12 = vsub.f32 %v4575_v50, %v2118_v55  ;;  %v4683_v14 = vsub.f32 %v4579_v60, %v2118_v55  ;;  %v4686_v24 = vsub.f32 %v4583_v62, %v2118_v55 }
 0x216   : > { %v4689_v26 = vsub.f32 %v4587_v10, %v2118_v55  ;;  %v4692_v36 = vsub.f32 %v4591_v13, %v2118_v55  ;;  %v4695_v38 = vsub.f32 %v4595_v25, %v2118_v55  ;;  %v4698_v48 = vsub.f32 %v4599_v28, %v2118_v55 }
 0x217   : > { %v4701_v50 = vsub.f32 %v4603_v40, %v2118_v55  ;;  %v4704_v60 = vsub.f32 %v4607_v42, %v2118_v55  ;;  %v4707_v62 = vsub.f32 %v4611_v54, %v2118_v55  ;;  %v4710_v10 = vsub.f32 %v4615_v56, %v2118_v55 }
 0x218   : > { %v4713_v13 = vsub.f32 %v4619_v7, %v2118_v55  ;;  %v4716_v25 = vsub.f32 %v4623_v8, %v2118_v55  ;;  %v4719_v28 = vsub.f32 %v4627_v22, %v2118_v55  ;;  %v4722_v40 = vsub.f32 %v4631_v27, %v2118_v55 }
 0x219   : > { %v4725_v42 = vsub.f32 %v4635_v41, %v2118_v55  ;;  %v4728_v54 = vsub.f32 %v4639_v44, %v2118_v55  ;;  %v4731_v56 = vsub.f32 %v4643_v58, %v2118_v55  ;;  %v4733_v7 = vsub.f32 %v1851_v61, %v2118_v55 }
 0x21a   : > { %v4735_v0 = vsub.f32 %v1900_v16, %v2118_v55  ;;  %v4737_v8 = vsub.f32 %v1949_v18, %v2118_v55  ;;  %v4739_v22 = vsub.f32 %v1998_v34, %v2118_v55  ;;  %v4741_v9 = vsub.f32 %v2047_v37, %v2118_v55 }
 0x21b   : > { %v2151_v27 = vmul.f32 %v4653_v57, %v4653_v57  ;;  %v2152_v41 = vmul.f32 %v4656_v59, %v4656_v59  ;;  %v2153_v44 = vmul.f32 %v4659_v63, %v4659_v63  ;;  %v2154_v58 = vmul.f32 %v4662_v1, %v4662_v1 }
 0x21c   : > { %v2155_v16 = vmul.f32 %v4665_v3, %v4665_v3  ;;  %v2156_v19 = vmul.f32 %v4668_v5, %v4668_v5  ;;  %v2157_v23 = vmul.f32 %v4671_v6, %v4671_v6  ;;  %v2158_v31 = vmul.f32 %v4674_v2, %v4674_v2 }
 0x21d   : > { %v2183_v61 = vsel %vm2053_vm2, %v2151_v27, 0.0  ;;  %v2184_v11 = vsel %vm2053_vm2, %v2152_v41, 0.0  ;;  %v2186_v17 = vsel %vm2053_vm2, %v2153_v44, 0.0  ;;  %v2188_v20 = vsel %vm2053_vm2, %v2154_v58, 0.0 }
 0x21e   : > { %v2185_v15 = vadd.f32 %v2184_v11, %v2183_v61  ;;  %v2190_v29 = vsel %vm2053_vm2, %v2155_v16, 0.0  ;;  %v2192_v32 = vsel %vm2053_vm2, %v2156_v19, 0.0  ;;  %v2159_v34 = vmul.f32 %v4677_v4, %v4677_v4 }
 0x21f   : > { %v2194_v35 = vsel %vm2053_vm2, %v2157_v23, 0.0  ;;  %v2160_v39 = vmul.f32 %v4680_v12, %v4680_v12  ;;  %v2196_v43 = vsel %vm2053_vm2, %v2158_v31, 0.0  ;;  %v2161_v46 = vmul.f32 %v4683_v14, %v4683_v14 }
 0x220   : > { %v2187_v18 = vadd.f32 %v2186_v17, %v2185_v15  ;;  %v2198_v47 = vsel %vm2053_vm2, %v2159_v34, 0.0  ;;  %v2162_v51 = vmul.f32 %v4686_v24, %v4686_v24  ;;  %v2163_v55 = vmul.f32 %v4689_v26, %v4689_v26 }
 0x221   : > { %v2200_v52 = vsel %vm2053_vm2, %v2160_v39, 0.0  ;;  %v2202_v27 = vsel %vm2053_vm2, %v2161_v46, 0.0  ;;  %v2164_v44 = vmul.f32 %v4692_v36, %v4692_v36  ;;  %v2165_v11 = vmul.f32 %v4695_v38, %v4695_v38 }
 0x222   : > { %v2189_v21 = vadd.f32 %v2188_v20, %v2187_v18  ;;  %v2204_v58 = vsel %vm2053_vm2, %v2162_v51, 0.0  ;;  %v2206_v15 = vsel %vm2053_vm2, %v2163_v55, 0.0  ;;  %v2166_v17 = vmul.f32 %v4698_v48, %v4698_v48 }
 0x223   : > { %v2208_v18 = vsel %vm2053_vm2, %v2164_v44, 0.0  ;;  %v2167_v20 = vmul.f32 %v4701_v50, %v4701_v50 }
 0x224   : > { %v2191_v30 = vadd.f32 %v2190_v29, %v2189_v21  ;;  %v2210_v21 = vsel %vm2053_vm2, %v2165_v11, 0.0  ;;  %v2168_v29 = vmul.f32 %v4704_v60, %v4704_v60 }
 0x226   : > { %v2193_v33 = vadd.f32 %v2192_v32, %v2191_v30  ;;  %v2212_v30 = vsel %vm2053_vm2, %v2166_v17, 0.0  ;;  %v2169_v32 = vmul.f32 %v4707_v62, %v4707_v62 }
 0x228   : > { %v2195_v37 = vadd.f32 %v2194_v35, %v2193_v33  ;;  %v2214_v33 = vsel %vm2053_vm2, %v2167_v20, 0.0  ;;  %v2170_v35 = vmul.f32 %v4710_v10, %v4710_v10 }
 0x22a   : > { %v2197_v45 = vadd.f32 %v2196_v43, %v2195_v37  ;;  %v2216_v37 = vsel %vm2053_vm2, %v2168_v29, 0.0  ;;  %v2171_v43 = vmul.f32 %v4713_v13, %v4713_v13 }
 0x22c   : > { %v2199_v49 = vadd.f32 %v2198_v47, %v2197_v45  ;;  %v2218_v45 = vsel %vm2053_vm2, %v2169_v32, 0.0  ;;  %v2172_v47 = vmul.f32 %v4716_v25, %v4716_v25 }
 0x22e   : > { %v2201_v53 = vadd.f32 %v2200_v52, %v2199_v49  ;;  %v2220_v49 = vsel %vm2053_vm2, %v2170_v35, 0.0  ;;  %v2173_v52 = vmul.f32 %v4719_v28, %v4719_v28 }
 0x230   : > { %v2203_v41 = vadd.f32 %v2202_v27, %v2201_v53  ;;  %v2222_v53 = vsel %vm2053_vm2, %v2171_v43, 0.0  ;;  %v2174_v27 = vmul.f32 %v4722_v40, %v4722_v40 }
 0x232   : > { %v2205_v61 = vadd.f32 %v2204_v58, %v2203_v41  ;;  %v2224_v41 = vsel %vm2053_vm2, %v2172_v47, 0.0  ;;  %v2175_v58 = vmul.f32 %v4725_v42, %v4725_v42 }
 0x234   : > { %v2207_v16 = vadd.f32 %v2206_v15, %v2205_v61  ;;  %v2226_v61 = vsel %vm2053_vm2, %v2173_v52, 0.0  ;;  %v2176_v15 = vmul.f32 %v4728_v54, %v4728_v54 }
 0x236   : > { %v2209_v19 = vadd.f32 %v2208_v18, %v2207_v16  ;;  %v2228_v16 = vsel %vm2053_vm2, %v2174_v27, 0.0  ;;  %v2177_v18 = vmul.f32 %v4731_v56, %v4731_v56 }
 0x238   : > { %v2211_v23 = vadd.f32 %v2210_v21, %v2209_v19  ;;  %v2230_v19 = vsel %vm2053_vm2, %v2175_v58, 0.0  ;;  %v2178_v21 = vmul.f32 %v4733_v7, %v4733_v7  ;;  %v2317_v58 = vlaneseq }
 0x23a   : > { %v2213_v31 = vadd.f32 %v2212_v30, %v2211_v23  ;;  %v2232_v23 = vsel %vm2053_vm2, %v2176_v15, 0.0  ;;  %v2179_v30 = vmul.f32 %v4735_v0, %v4735_v0 }
 0x23c   : > { %v2215_v34 = vadd.f32 %v2214_v33, %v2213_v31  ;;  %v2234_v31 = vsel %vm2053_vm2, %v2177_v18, 0.0  ;;  %v2180_v33 = vmul.f32 %v4737_v8, %v4737_v8 }
 0x23e   : > { %v2217_v39 = vadd.f32 %v2216_v37, %v2215_v34  ;;  %v2236_v34 = vsel %vm2053_vm2, %v2178_v21, 0.0  ;;  %v2181_v37 = vmul.f32 %v4739_v22, %v4739_v22 }
 0x240   : > { %v2219_v46 = vadd.f32 %v2218_v45, %v2217_v39  ;;  %v2238_v39 = vsel %vm2053_vm2, %v2179_v30, 0.0  ;;  %v2182_v45 = vmul.f32 %v4741_v9, %v4741_v9 }
 0x242   : > { %v2221_v51 = vadd.f32 %v2220_v49, %v2219_v46  ;;  %v2240_v46 = vsel %vm2053_vm2, %v2180_v33, 0.0  ;;  %v2242_v49 = vsel %vm2053_vm2, %v2181_v37, 0.0  ;;  %v2244_v52 = vsel %vm2053_vm2, %v2182_v45, 0.0 }
 0x244   : > { %v2223_v55 = vadd.f32 %v2222_v53, %v2221_v51 }
 0x246   : > { %v2225_v44 = vadd.f32 %v2224_v41, %v2223_v55  ;;  %v4003_v41 = vmov 1983009808  }
 0x248   : > { %v2227_v11 = vadd.f32 %v2226_v61, %v2225_v44  ;;  %v2315_v44 = vunpack.c.l.s4 %v4003_v41  ;;  %v4004_v61 = vmov 1934713408  }
 0x24a   : > { %v2229_v17 = vadd.f32 %v2228_v16, %v2227_v11  ;;  %v2348_v11 = vunpack.c.l.s4 %v4004_v61  ;;  %v2316_v15 = vunpack.c.0.s8 %v2315_v44  ;;  %v2318_v16 = vshrl.u32 %v2317_v58, 7 }
 0x24c   : > { %v2231_v20 = vadd.f32 %v2230_v19, %v2229_v17  ;;  %v2349_v17 = vunpack.c.0.s8 %v2348_v11  ;;  %v4839_v19 = vsub.s32 %v2316_v15, %v2318_v16 }
 0x24e   : > { %v2233_v29 = vadd.f32 %v2232_v23, %v2231_v20  ;;  %v4841_v20 = vsub.s32 %v2349_v17, %v2318_v16 }
 0x250   : > { %v2235_v32 = vadd.f32 %v2234_v31, %v2233_v29 }
 0x252   : > { %v2237_v35 = vadd.f32 %v2236_v34, %v2235_v32 }
 0x254   : > { %v2239_v43 = vadd.f32 %v2238_v39, %v2237_v35 }
 0x256   : > { %v2241_v47 = vadd.f32 %v2240_v46, %v2239_v43 }
 0x258   : > { %v2243_v51 = vadd.f32 %v2242_v49, %v2241_v47 }
 0x25a   : > { %v2245_v53 = vadd.f32 %v2244_v52, %v2243_v51 }
 0x25c   : > { %v2246_v55 = vmul.f32 0.03125, %v2245_v53 }
 0x25e   : > { %v2247_v27 = vadd.f32 1e-05, %v2246_v55 }
 0x260   : > { %3720 = vrsqrt.f32 %v2247_v27 }
 0x26a   : > { %v3721_v18 = vpop.eup %3720 }
 0x26b   : > { %v2274_v21 = vmul.f32 %v3721_v18, %v4728_v54  ;;  %v2276_v23 = vmul.f32 %v3721_v18, %v4733_v7  ;;  %v2278_v29 = vmul.f32 %v3721_v18, %v4737_v8  ;;  %v2280_v30 = vmul.f32 %v3721_v18, %v4741_v9 }
 0x26c   : > { %v2249_v31 = vmul.f32 %v3721_v18, %v4653_v57  ;;  %v2250_v32 = vmul.f32 %v3721_v18, %v4656_v59  ;;  %v2251_v33 = vmul.f32 %v3721_v18, %v4659_v63  ;;  %v2252_v34 = vmul.f32 %v3721_v18, %v4662_v1 }
 0x26d   : > { %v3251_v35 = vpack.c.bf16 %v2278_v29, %v2274_v21  ;;  %v3252_v37 = vpack.c.bf16 %v2280_v30, %v2276_v23  ;;  %v2253_v39 = vmul.f32 %v3721_v18, %v4665_v3  ;;  %v2254_v54 = vmul.f32 %v3721_v18, %v4668_v5 }
 0x26e   : > { %v2255_v7 = vmul.f32 %v3721_v18, %v4671_v6  ;;  %v2256_v8 = vmul.f32 %v3721_v18, %v4674_v2  ;;  %v2257_v9 = vmul.f32 %v3721_v18, %v4677_v4  ;;  %v2258_v57 = vmul.f32 %v3721_v18, %v4680_v12 }
 0x26f   : > { %v4858_v59 = vrot.slane %v3251_v35, %v4839_v19  ;;  %v4861_v63 = vrot.slane %v3252_v37, %v4839_v19  ;;  %v2259_v1 = vmul.f32 %v3721_v18, %v4683_v14  ;;  %v2260_v3 = vmul.f32 %v3721_v18, %v4686_v24 }
 0x270   : > { %v2261_v5 = vmul.f32 %v3721_v18, %v4689_v26  ;;  %v2262_v6 = vmul.f32 %v3721_v18, %v4692_v36  ;;  %v2263_v2 = vmul.f32 %v3721_v18, %v4695_v38  ;;  %v2264_v4 = vmul.f32 %v3721_v18, %v4698_v48 }
 0x271   : > { %v2565_v12 = vcombine.low %v4858_v59, %v4861_v63  ;;  %v2566_v43 = vcombine.high %v4858_v59, %v4861_v63  ;;  %v2265_v45 = vmul.f32 %v3721_v18, %v4701_v50  ;;  %v2266_v14 = vmul.f32 %v3721_v18, %v4704_v60 }
 0x272   : > { %v2267_v24 = vmul.f32 %v3721_v18, %v4707_v62  ;;  %v2268_v26 = vmul.f32 %v3721_v18, %v4710_v10  ;;  %v2269_v36 = vmul.f32 %v3721_v18, %v4713_v13  ;;  %v2270_v38 = vmul.f32 %v3721_v18, %v4716_v25 }
 0x273   : > { %v2271_v48 = vmul.f32 %v3721_v18, %v4719_v28  ;;  %v2272_v46 = vmul.f32 %v3721_v18, %v4722_v40  ;;  %v2273_v47 = vmul.f32 %v3721_v18, %v4725_v42  ;;  %v2275_v49 = vmul.f32 %v3721_v18, %v4731_v56 }
 0x274   : > { %v2277_v50 = vmul.f32 %v3721_v18, %v4735_v0  ;;  %v2279_v60 = vmul.f32 %v3721_v18, %v4739_v22  ;;  %v3237_v51 = vpack.c.bf16 %v2253_v39, %v2249_v31  ;;  %v3238_v62 = vpack.c.bf16 %v2255_v7, %v2251_v33 }
 0x275   : > { %v3239_v52 = vpack.c.bf16 %v2261_v5, %v2257_v9  ;;  %v3240_v10 = vpack.c.bf16 %v2263_v2, %v2259_v1  ;;  %v3241_v53 = vpack.c.bf16 %v2254_v54, %v2250_v32  ;;  %v3242_v13 = vpack.c.bf16 %v2256_v8, %v2252_v34 }
 0x276   : > { %v3243_v55 = vpack.c.bf16 %v2262_v6, %v2258_v57  ;;  %v3244_v25 = vpack.c.bf16 %v2264_v4, %v2260_v3  ;;  %v3245_v27 = vpack.c.bf16 %v2269_v36, %v2265_v45  ;;  %v3246_v28 = vpack.c.bf16 %v2271_v48, %v2267_v24 }
 0x277   : > { %v3247_v41 = vpack.c.bf16 %v2277_v50, %v2273_v47  ;;  %v3248_v40 = vpack.c.bf16 %v2279_v60, %v2275_v49  ;;  %v3249_v44 = vpack.c.bf16 %v2270_v38, %v2266_v14  ;;  %v3250_v42 = vpack.c.bf16 %v2272_v46, %v2268_v26 }
 0x278   : > { %v2320_v56 = vrot.slane %v3237_v51, %v4839_v19  ;;  %v2328_v0 = vrot.slane %v3238_v62, %v4839_v19  ;;  %v2336_v22 = vrot.slane %v3239_v52, %v4839_v19  ;;  %v2344_v58 = vrot.slane %v3240_v10, %v4839_v19 }
 0x279   : > { %v2388_v61 = vrot.slane %v3241_v53, %v4839_v19  ;;  %v2396_v11 = vrot.slane %v3242_v13, %v4839_v19  ;;  %v2404_v15 = vrot.slane %v3243_v55, %v4839_v19  ;;  %v2412_v16 = vrot.slane %v3244_v25, %v4839_v19 }
 0x27a   : > { %v2456_v17 = vrot.slane %v3245_v27, %v4839_v19  ;;  %v2464_v18 = vrot.slane %v3246_v28, %v4839_v19  ;;  %v2472_v21 = vrot.slane %v3247_v41, %v4839_v19  ;;  %v2480_v23 = vrot.slane %v3248_v40, %v4839_v19 }
 0x27b   : > { %v2524_v29 = vrot.slane %v3249_v44, %v4839_v19  ;;  %v2532_v30 = vrot.slane %v3250_v42, %v4839_v19  ;;  %v2346_v31 = vcombine.high %v2320_v56, %v2328_v0  ;;  %v2362_v32 = vcombine.high %v2336_v22, %v2344_v58 }
 0x27c   : > { %v2481_v33 = vcombine.low %v2456_v17, %v2464_v18  ;;  %v2482_v34 = vcombine.high %v2456_v17, %v2464_v18  ;;  %v2497_v35 = vcombine.low %v2472_v21, %v2480_v23  ;;  %v2498_v37 = vcombine.high %v2472_v21, %v2480_v23 }
 0x27d   : > { %v2549_v39 = vcombine.low %v2524_v29, %v2532_v30  ;;  %v2550_v54 = vcombine.high %v2524_v29, %v2532_v30  ;;  %v2360_v7 = vrot.slane %v2346_v31, %v4841_v20  ;;  %v2376_v8 = vrot.slane %v2362_v32, %v4841_v20 }
 0x27e   : > { %v2414_v9 = vcombine.high %v2388_v61, %v2396_v11  ;;  %v2430_v57 = vcombine.high %v2404_v15, %v2412_v16  ;;  %v2345_v1 = vcombine.low %v2320_v56, %v2328_v0  ;;  %v2361_v3 = vcombine.low %v2336_v22, %v2344_v58 }
 0x27f   : > { %v2379_v5 = vcombine.low %v2360_v7, %v2376_v8  ;;  %v2413_v6 = vcombine.low %v2388_v61, %v2396_v11  ;;  %v2429_v2 = vcombine.low %v2404_v15, %v2412_v16  ;;  %v2380_v19 = vcombine.high %v2360_v7, %v2376_v8 }
 0x280   : > { %v2428_v4 = vrot.slane %v2414_v9, %v4841_v20  ;;  %v2444_v45 = vrot.slane %v2430_v57, %v4841_v20  ;;  %v2353_v14 = vrot.slane %v2345_v1, %v4841_v20  ;;  %v2369_v24 = vrot.slane %v2361_v3, %v4841_v20 }
 0x281   : > { %v2600_v26 = vshrl.u32 %v2379_v5, 16  ;;  %v2421_v36 = vrot.slane %v2413_v6, %v4841_v20  ;;  %v2437_v38 = vrot.slane %v2429_v2, %v4841_v20  ;;  %v2489_v48 = vrot.slane %v2481_v33, %v4841_v20  ;;  %v3717_v6 = vld [vmem:[#allocation8 + $0x8] sm:$0xff]  }
 0x282   : > { %v2447_v46 = vcombine.low %v2428_v4, %v2444_v45  ;;  %v2378_v47 = vcombine.high %v2353_v14, %v2369_v24  ;;  %v4908_v49 = vcombine.low %v2353_v14, %v2369_v24  ;;  %v2448_v50 = vcombine.high %v2428_v4, %v2444_v45 }
 0x283   : > { %v4910_v60 = vcombine.low %v2421_v36, %v2437_v38  ;;  %v2446_v51 = vcombine.high %v2421_v36, %v2437_v38  ;;  %v2505_v62 = vrot.slane %v2497_v35, %v4841_v20  ;;  %v2557_v52 = vrot.slane %v2549_v39, %v4841_v20  ;;  %v3719_v36 = vld [vmem:[#allocation10 + $0x8] sm:$0xff]   ;;  %v2855_v38 = vld [vmem:[%s4341_s11] sm:$0xff] }
 0x284   : > { %v2599_v10 = vpack.i.b16 %v2447_v46, %v2379_v5  ;;  %v2601_v53 = vshrl.u32 %v2447_v46, 16  ;;  %v2594_v13 = vshrl.u32 %v2378_v47, 16  ;;  %v2605_v55 = vpack.i.b16 %v2448_v50, %v2380_v19  ;;  %v3716_v5 = vld [vmem:[#allocation8] sm:$0xff]   ;;  %v2856_v46 = vld [vmem:[%s4341_s11 + $0x8] sm:$0xff] }
 0x285   : > { %v2593_v25 = vpack.i.b16 %v2446_v51, %v2378_v47  ;;  %v2595_v27 = vshrl.u32 %v2446_v51, 16  ;;  %v2514_v28 = vcombine.high %v2489_v48, %v2505_v62  ;;  %v2573_v41 = vrot.slane %v2565_v12, %v4841_v20  ;;  %3550 = vmatprep.subr.bf16.mxu0 %v3716_v5  ;;  %v2858_v51 = vld [vmem:[%s4341_s11 + $0x18] sm:$0xff] }
 0x286   : > { %2645 = vrot.lane.b32.xlu1 %v2599_v10, %s4005_s24  ;;  %v4919_v40 = vcombine.low %v2489_v48, %v2505_v62  ;;  %v2496_v44 = vrot.slane %v2482_v34, %v4841_v20  ;;  %v2512_v42 = vrot.slane %v2498_v37, %v4841_v20  ;;  %v2564_v56 = vrot.slane %v2550_v54, %v4841_v20  ;;  %v2860_v10 = vld [vmem:[%s4341_s11 + $0x28] sm:$0xff] }
 0x287   : > { %2637 = vrot.lane.b32.xlu0 %v2593_v25, %s4006_s28  ;;  %v2582_v0 = vcombine.high %v2557_v52, %v2573_v41  ;;  %v4924_v22 = vcombine.low %v2557_v52, %v2573_v41  ;;  %v2580_v12 = vrot.slane %v2566_v43, %v4841_v20  ;;  %v2596_v58 = vpack.i.b16 %v2595_v27, %v2594_v13  ;;  %v2859_v52 = vld [vmem:[%s4341_s11 + $0x20] sm:$0xff] }
 0x288   : > { %v2612_v61 = vshrl.u32 %v4919_v40, 16  ;;  %v2515_v11 = vcombine.low %v2496_v44, %v2512_v42  ;;  %v2588_v15 = vshrl.u32 %v4908_v49, 16  ;;  %v2589_v16 = vshrl.u32 %v4910_v60, 16  ;;  %3551 = vmatpush3.bf16.msra.mxu0 %v3716_v5 }
 0x289   : > { %v2617_v17 = vpack.i.b16 %v2582_v0, %v2514_v28  ;;  %v2613_v18 = vshrl.u32 %v4924_v22, 16  ;;  %v2583_v21 = vcombine.low %v2564_v56, %v2580_v12  ;;  %v2602_v23 = vpack.i.b16 %v2601_v53, %v2600_v26  ;;  %3552 = vmatprep.subr.bf16.mxu0 %v3717_v6  ;;  %v3718_v26 = vld [vmem:[#allocation10] sm:$0xff]  }
 0x28a   : > { %2653 = vrot.lane.b32.xlu1 %v2605_v55, %s4007_s12  ;;  %v2590_v29 = vpack.i.b16 %v2589_v16, %v2588_v15  ;;  %v2618_v30 = vshrl.u32 %v2514_v28, 16  ;;  %v2619_v59 = vshrl.u32 %v2582_v0, 16  ;;  %v2606_v20 = vshrl.u32 %v2380_v19, 16  ;;  %3562 = vmatprep.subr.bf16.mxu1 %v3718_v26 }
 0x28b   : > { %2639 = vrot.lane.b32.xlu0 %v2617_v17, %s4006_s28  ;;  %v2614_v63 = vpack.i.b16 %v2613_v18, %v2612_v61  ;;  %v2623_v43 = vpack.i.b16 %v2583_v21, %v2515_v11  ;;  %v2607_v31 = vshrl.u32 %v2448_v50, 16  ;;  %v2624_v32 = vshrl.u32 %v2515_v11, 16  ;;  %3563 = vmatpush3.bf16.msra.mxu1 %v3718_v26  ;;  %v2862_v61 = vld [vmem:[%s4341_s11 + $0x38] sm:$0xff] }
 0x28c   : > { %v2620_v33 = vpack.i.b16 %v2619_v59, %v2618_v30  ;;  %v2625_v34 = vshrl.u32 %v2583_v21, 16  ;;  %v2516_v35 = vcombine.high %v2496_v44, %v2512_v42  ;;  %v2584_v37 = vcombine.high %v2564_v56, %v2580_v12  ;;  %3553 = vmatpush3.bf16.msra.mxu0 %v3717_v6  ;;  %3564 = vmatprep.subr.bf16.mxu1 %v3719_v36 }
 0x28d   : > { %v2608_v39 = vpack.i.b16 %v2607_v31, %v2606_v20  ;;  %v2611_v54 = vpack.i.b16 %v4924_v22, %v4919_v40  ;;  %v2587_v7 = vpack.i.b16 %v4910_v60, %v4908_v49  ;;  %v2863_v49 = vpack.c.bf16 %v2856_v46, %v2855_v38  ;;  %v2857_v60 = vld [vmem:[%s4341_s11 + $0x10] sm:$0xff] }
 0x28e   : > { %2635 = vrot.lane.b32.xlu1 %v2614_v63, %s4008_s7  ;;  %v2626_v8 = vpack.i.b16 %v2625_v34, %v2624_v32  ;;  %v2630_v9 = vshrl.u32 %v2516_v35, 16  ;;  %v2631_v57 = vshrl.u32 %v2584_v37, 16  ;;  %v2629_v1 = vpack.i.b16 %v2584_v37, %v2516_v35 }
 0x28f   : > { %2647 = vrot.lane.b32.xlu0 %v2623_v43, %s4005_s24  ;;  %3566 = vmatprep.mubr.msk.bf16.mxu1 %vm2676_vm4, %v2863_v49  ;;  %v2864_v28 = vpack.c.bf16 %v2858_v51, %v2857_v60  ;;  %v2865_v40 = vpack.c.bf16 %v2860_v10, %v2859_v52 }
 0x290   : > { %v2632_v3 = vpack.i.b16 %v2631_v57, %v2630_v9  ;;  %3565 = vmatpush3.bf16.msra.mxu1 %v3719_v36 }
 0x292   : > { %2641 = vrot.lane.b32.xlu1 %v2596_v58, %s4009_s27  ;;  %v2861_v58 = vld [vmem:[%s4341_s11 + $0x30] sm:$0xff] }
 0x293   : > { %2633 = vrot.lane.b32.xlu0 %v2590_v29, %s4008_s7  ;;  %3567 = vmatmul.mubr.msk.bf16.vlgmr.msra.gmra.mrb[64].mxu1 %vm2676_vm4, %v2864_v28  ;;  %v2866_v18 = vpack.c.bf16 %v2862_v61, %v2861_v58 }
 0x294   : > { %3570 = vmatprep.mubr.msk.bf16.mxu1 %vm2676_vm4, %v2865_v40 }
 0x296   : > { %2649 = vrot.lane.b32.xlu1 %v2602_v23, %s4010_s16 }
 0x297   : > { %2643 = vrot.lane.b32.xlu0 %v2620_v33, %s4009_s27 }
 0x29a   : > { %2657 = vrot.lane.b32.xlu1 %v2608_v39, %s4011_s1 }
 0x29b   : > { %2651 = vrot.lane.b32.xlu0 %v2626_v8, %s4010_s16  ;;  %3571 = vmatmul.mubr.msk.bf16.gmra.mrb[68].mxu1 %vm2676_vm4, %v2866_v18 }
 0x29e   : > { %2659 = vrot.lane.b32.xlu1 %v2632_v3, %s4011_s1 }
 0x29f   : > { %2655 = vrot.lane.b32.xlu0 %v2629_v1, %s4007_s12 }
 0x2f8   : > { %v2646_v2 = vpop.permute.xlu1 %2645 }
 0x2f9   : > { %v2638_v19 = vpop.permute.xlu0 %2637 }
 0x2fc   : > { %v2654_v4 = vpop.permute.xlu1 %2653 }
 0x2fd   : > { %v2640_v45 = vpop.permute.xlu0 %2639 }
 0x300   : > { %v2636_v14 = vpop.permute.xlu1 %2635 }
 0x301   : > { %v2648_v24 = vpop.permute.xlu0 %2647  ;;  %v2666_v55 = vsel %vm2053_vm2, %v2611_v54, %v2636_v14 }
 0x302   : > { %v2670_v44 = vsel %vm490_vm1, %v2666_v55, %v2640_v45 }
 0x304   : > { %v2642_v48 = vpop.permute.xlu1 %2641 }
 0x305   : > { %v2634_v47 = vpop.permute.xlu0 %2633 }
 0x306   : > { %v2663_v50 = vsel %vm2053_vm2, %v2587_v7, %v2634_v47 }
 0x307   : > { %v2668_v62 = vsel %vm490_vm1, %v2663_v50, %v2638_v19 }
 0x308   : > { %v2650_v53 = vpop.permute.xlu1 %2649  ;;  %v2673_v13 = vsel %vm2671_vm3, %v2668_v62, %v2642_v48 }
 0x309   : > { %v2678_v25 = vsel %vm2676_vm4, %v2673_v13, %v2646_v2  ;;  %v2644_v27 = vpop.permute.xlu0 %2643 }
 0x30a   : > { %v2683_v41 = vsel %vm2681_vm5, %v2678_v25, %v2650_v53  ;;  %v2675_v0 = vsel %vm2671_vm3, %v2670_v44, %v2644_v27 }
 0x30b   : > { %v2688_v56 = vsel %vm2686_vm6, %v2683_v41, %v2654_v4  ;;  %v2680_v11 = vsel %vm2676_vm4, %v2675_v0, %v2648_v24 }
 0x30c   : > { %v2658_v42 = vpop.permute.xlu1 %2657 }
 0x30d   : > { %v2652_v22 = vpop.permute.xlu0 %2651  ;;  %v2693_v12 = vsel %vm2691_vm7, %v2688_v56, %v2658_v42 }
 0x30e   : > { %2702 = vxpose.xlu0.c.b16.start [1/2] (short) (narrow) %v2693_v12, 64  ;;  %v2685_v16 = vsel %vm2681_vm5, %v2680_v11, %v2652_v22 }
 0x310   : > { %v2660_v15 = vpop.permute.xlu1 %2659 }
 0x311   : > { %v2656_v17 = vpop.permute.xlu0 %2655 }
 0x312   : > { %v2690_v21 = vsel %vm2686_vm6, %v2685_v16, %v2656_v17 }
 0x313   : > { %v2696_v23 = vsel %vm2691_vm7, %v2690_v21, %v2660_v15 }
 0x314   : > { %2703 = vxpose.xlu0.c.b16.end [2/2] (short) (narrow) %v2696_v23, 64 }
 0x366   : > { %v3568_v63 = vpop.f32.mrb[64].mxu1 }
 0x367   : > { %v2929_v43 = vpop.f32.mrb[65].mxu1 }
 0x368   : > { %v3569_v31 = vpop.f32.mrb[66].mxu1 }
 0x369   : > { %v4973_v32 = vpop.f32.mrb[67].mxu1 }
 0x36e   : > { %v4975_v33 = vpop.f32.mrb[68].mxu1 }
 0x36f   : > { %v4977_v34 = vpop.f32.mrb[69].mxu1 }
 0x370   : > { %v4979_v35 = vpop.f32.mrb[70].mxu1 }
 0x371   : > { %v4981_v37 = vpop.f32.mrb[71].mxu1 }
 0x376   : > { %v2710_v29 = vpop.trf.xlu0 }
 0x377   : > { %3554 = vmatprep.mubr.msk.bf16.mxu0 %vm2676_vm4, %v2710_v29 }
 0x37a   : > { %v2711_v30 = vpop.trf.xlu0 }
 0x37b   : > { %3555 = vmatmul.mubr.msk.bf16.vlgmr.msra.gmra.mrb[64].mxu0 %vm2676_vm4, %v2711_v30 }
 0x37e   : > { %v2712_v59 = vpop.trf.xlu0 }
 0x37f   : > { %3558 = vmatprep.mubr.msk.bf16.mxu0 %vm2676_vm4, %v2712_v59 }
 0x382   : > { %v2713_v20 = vpop.trf.xlu0 }
 0x383   : > { %3559 = vmatmul.mubr.msk.bf16.gmra.mrb[68].mxu0 %vm2676_vm4, %v2713_v20 }
 0x44e   : > { %v3556_v39 = vpop.f32.mrb[64].mxu0 }
 0x44f   : > { %v3261_v54 = vmul.f32 -1.442695, %v3556_v39  ;;  %v2776_v7 = vpop.f32.mrb[65].mxu0 }
 0x450   : > { %v3259_v8 = vmul.f32 -1.442695, %v2776_v7  ;;  %v3557_v9 = vpop.f32.mrb[66].mxu0 }
 0x451   : > { %3722 = vpow2.f32 %v3261_v54  ;;  %v3262_v57 = vmul.f32 -1.442695, %v3557_v9  ;;  %v2779_v1 = vpop.f32.mrb[67].mxu0 }
 0x452   : > { %3724 = vpow2.f32 %v3259_v8  ;;  %v3260_v3 = vmul.f32 -1.442695, %v2779_v1 }
 0x453   : > { %3726 = vpow2.f32 %v3262_v57 }
 0x454   : > { %3728 = vpow2.f32 %v3260_v3 }
 0x456   : > { %v3560_v5 = vpop.f32.mrb[68].mxu0 }
 0x457   : > { %v3265_v6 = vmul.f32 -1.442695, %v3560_v5  ;;  %v2792_v2 = vpop.f32.mrb[69].mxu0 }
 0x458   : > { %v3263_v19 = vmul.f32 -1.442695, %v2792_v2  ;;  %v3561_v4 = vpop.f32.mrb[70].mxu0 }
 0x459   : > { %3730 = vpow2.f32 %v3265_v6  ;;  %v3266_v45 = vmul.f32 -1.442695, %v3561_v4  ;;  %v2795_v14 = vpop.f32.mrb[71].mxu0 }
 0x45a   : > { %3732 = vpow2.f32 %v3263_v19  ;;  %v3264_v24 = vmul.f32 -1.442695, %v2795_v14 }
 0x45b   : > { %v3723_v26 = vpop.eup %3722  ;;  %3734 = vpow2.f32 %v3266_v45 }
 0x45c   : > { %v3725_v36 = vpop.eup %3724  ;;  %v2833_v38 = vadd.f32 1.0, %v3723_v26  ;;  %3736 = vpow2.f32 %v3264_v24 }
 0x45d   : > { %v3727_v48 = vpop.eup %3726  ;;  %v2831_v46 = vadd.f32 1.0, %v3725_v36 }
 0x45e   : > { %v3729_v47 = vpop.eup %3728  ;;  %3738 = vrcp.f32 %v2833_v38  ;;  %v2834_v49 = vadd.f32 1.0, %v3727_v48 }
 0x45f   : > { %3740 = vrcp.f32 %v2831_v46  ;;  %v2832_v50 = vadd.f32 1.0, %v3729_v47 }
 0x460   : > { %3742 = vrcp.f32 %v2834_v49 }
 0x461   : > { %3744 = vrcp.f32 %v2832_v50 }
 0x463   : > { %v3731_v60 = vpop.eup %3730 }
 0x464   : > { %v3733_v51 = vpop.eup %3732  ;;  %v2837_v62 = vadd.f32 1.0, %v3731_v60 }
 0x465   : > { %v3735_v52 = vpop.eup %3734  ;;  %v2835_v10 = vadd.f32 1.0, %v3733_v51 }
 0x466   : > { %v3737_v53 = vpop.eup %3736  ;;  %3746 = vrcp.f32 %v2837_v62  ;;  %v2838_v13 = vadd.f32 1.0, %v3735_v52 }
 0x467   : > { %3748 = vrcp.f32 %v2835_v10  ;;  %v2836_v55 = vadd.f32 1.0, %v3737_v53 }
 0x468   : > { %v3739_v25 = vpop.eup %3738  ;;  %3750 = vrcp.f32 %v2838_v13 }
 0x469   : > { %v3741_v27 = vpop.eup %3740  ;;  %3752 = vrcp.f32 %v2836_v55  ;;  %v2962_v28 = vmul.f32 %v3739_v25, %v3568_v63 }
 0x46a   : > { %v3743_v41 = vpop.eup %3742  ;;  %v2960_v40 = vmul.f32 %v3741_v27, %v2929_v43 }
 0x46b   : > { %v3745_v44 = vpop.eup %3744  ;;  %2970 = vst.msk [vmem:[%s384_s13 + $0x10] sm:$0xff] %vm2676_vm4, %v2962_v28  ;;  %v2963_v42 = vmul.f32 %v3743_v41, %v3569_v31 }
 0x46c   : > { %2968 = vst.msk [vmem:[%s384_s13] sm:$0xff] %vm2676_vm4, %v2960_v40  ;;  %v2961_v56 = vmul.f32 %v3745_v44, %v4973_v32 }
 0x46d   : > { %2971 = vst.msk [vmem:[%s384_s13 + $0x18] sm:$0xff] %vm2676_vm4, %v2963_v42 }
 0x46e   : > { %2969 = vst.msk [vmem:[%s384_s13 + $0x8] sm:$0xff] %vm2676_vm4, %v2961_v56 }
 0x470   : > { %v3747_v0 = vpop.eup %3746 }
 0x471   : > { %v3749_v22 = vpop.eup %3748  ;;  %v2966_v12 = vmul.f32 %v3747_v0, %v4975_v33 }
 0x472   : > { %v3751_v58 = vpop.eup %3750  ;;  %v2964_v61 = vmul.f32 %v3749_v22, %v4977_v34 }
 0x473   : > { %v3753_v11 = vpop.eup %3752  ;;  %2974 = vst.msk [vmem:[%s384_s13 + $0x30] sm:$0xff] %vm2676_vm4, %v2966_v12  ;;  %v2967_v15 = vmul.f32 %v3751_v58, %v4979_v35 }
 0x474   : > { %2972 = vst.msk [vmem:[%s384_s13 + $0x20] sm:$0xff] %vm2676_vm4, %v2964_v61  ;;  %v2965_v16 = vmul.f32 %v3753_v11, %v4981_v37 }
 0x475   : > { %2975 = vst.msk [vmem:[%s384_s13 + $0x38] sm:$0xff] %vm2676_vm4, %v2967_v15 }
 0x476   : > { %2973 = vst.msk [vmem:[%s384_s13 + $0x28] sm:$0xff] %vm2676_vm4, %v2965_v16 }
 0x477   : > { %3913 = shalt.err (!%p3910_p11)
}
 0x478   : > { %s3914_s4 = scalar_lea.hbm %s4998_s18, 1024  ;;  %s3918_s28 = scalar_lea.hbm %s5109_s9, 2048 }
 0x479   : > { %p3915_p8 = scmp.ne.s32.totalorder %s4998_s18, %s3914_s4  ;;  %p3919_p3 = scmp.lt.u32.totalorder %s4998_s18, %s5109_s9 }
 0x47a   : > { %p3920_p10 = scmp.lt.u32.totalorder %s3918_s28, %s3914_s4  ;;  %p3922_p1 = scmp.lt.u32.totalorder %s3914_s4, %s4998_s18 }
 0x47b   : > { %p3916_p5 = pnand %p3915_p8, %p5110_p4 }
 0x47c   : > { %p3921_p12 = por %p3920_p10, %p3919_p3 }
 0x47d   : > { %p3917_p9 = pneg %p3916_p5 }
 0x47e   : > { %p3923_p0 = por %p3922_p1, %p3921_p12 }
 0x480   : > { %p3924_p7 = pnand %p3923_p0, %p3917_p9 }
 0x482   : > { %3927 = shalt.err (!%p3924_p7)
}
 0x483   : > { %s4013_s16 = smov 128  }
 0x484   : > { %3588 = dma.vmem_to_hbm [thread:$0]  (%p5110_p4), %s5002_s14, 1024, %s4998_s18, %s2977_s21, %s4013_s16, %s4013_s16, %s4008_s7  }
 0x485 PF: > { %s5111_s1 = sld [smem:[#allocation16_spill]]  ;;  %s5112_s13 = sld [smem:[#allocation17_spill]] }
 0x486   : > { %p5114_p13 = scmp.ge.s32.totalorder %s3990_s23, 2 }
 0x48b   : > { %s3008_s3 = sand.u32 1, %s5111_s1   ;;  %p5113_p2 = scmp.ne.s32.totalorder %s5112_s13, 0 }
 0x48c   : > { %s3009_s30 = scalar_lea.sflag [#allocation4], %s3008_s3 }
 0x48d   : > { %p3608_p6 = pnand %p5114_p13, %p5113_p2 }
 0x48f   : > { %3965 = dma.done.wait (!%p3608_p6), %s3009_s30, 1024  }
 0x490   : > { %3967 = vsyncadd (!%p3608_p6), %s3009_s30, 4294966272  ;;  %s25_s23 = sadd.s32 1, %s3990_s23   ;;  %s5115_s18 = smov %s3974_s19 }
 0x491   : > { %p22_p11 = scmp.ge.s32.totalorder %s25_s23, 4   ;;  %s5116_s19 = smov %s3978_s20 }
 0x492   : > { %s5117_s20 = smov %s4180_s5  ;;  %s5118_s21 = smov %s3986_s22 }
 0x493   : > { %s5119_s22 = smov %s5121_s10  ;;  %24 = sbr.rel (!%p22_p11) target bundleno = 14 (0xe), region = 117 }
 0x49a   :  { %3014 = vsyncpa [#allocation3], 1 }
 0x49b   :  { %3016 = vsyncpa [#allocation3 + $0x1], 1 }
 0x49c   :  { %3017 = vsyncpa [#allocation6], 1 }
 0x49d   :  { %3019 = vsyncpa [#allocation6 + $0x1], 1 }
 0x49e   :  { %3020 = vsyncpa [#allocation9], 1 }
 0x49f   :  { %3021 = vsyncpa [#allocation4], 1 }
 0x4a0   :  { %3023 = vsyncpa [#allocation4 + $0x1], 1 }

</bundles_post_ra>
